<compile_context>
chip_gen: v6e
topology: v6e:2x2x1
jax: 0.10.0
libtpu: 0.0.40
codegen_flags: <defaults>
</compile_context>

<pallas_src>
import functools

import jax
import jax.numpy as jnp
from jax.experimental import pallas as pl
from jax.experimental.pallas import tpu as pltpu

# Keep plain-JAX matmuls (reference + projections) in full f32 so the Pallas MXU
# matmuls (which run full f32) can be compared tightly against the reference.
jax.config.update("jax_default_matmul_precision", "highest")


# ---------------------------------------------------------------------------
# Glue: positions (reset per sequence) and segment ids from attention_mask_in_length.
# O(B * L * log L): cumsum + searchsorted (feedback item: replace O(L^2) glue).
# ---------------------------------------------------------------------------
def _positions_and_segments(index_tensor):
    lengths = index_tensor.astype(jnp.int32)
    B, L = lengths.shape
    cs = jnp.cumsum(lengths, axis=1)          # (B, L) inclusive ends
    starts = cs - lengths                     # (B, L) exclusive starts
    j = jnp.arange(L, dtype=jnp.int32)
    # segment containing token j = first k with cs[k] > j (skips zero-length entries)
    seg = jax.vmap(lambda c: jnp.searchsorted(c, j, side="right"))(cs)   # (B, L)
    total = cs[:, -1:]
    valid = j[None, :] < total
    seg_c = jnp.minimum(seg, L - 1).astype(jnp.int32)
    start = jnp.take_along_axis(starts, seg_c, axis=1)
    pos = jnp.where(valid, j[None, :] - start, 0)
    seg_id = jnp.where(valid, seg, -1).astype(jnp.int32)                 # -1 on padding
    return pos.astype(jnp.float32), seg_id


def _positions_and_segments_ref(index_tensor):
    # Independent brute-force version (used only by the pure-JAX reference).
    lengths = index_tensor.astype(jnp.int32)
    B, L = lengths.shape
    j = jnp.arange(L, dtype=jnp.int32)

    def per_row(row):
        cs = jnp.cumsum(row)
        starts = cs - row
        total = cs[-1]
        seg = jnp.sum((cs[None, :] <= j[:, None]).astype(jnp.int32), axis=1)
        start = starts[jnp.minimum(seg, L - 1)]
        pos = jnp.where(j < total, j - start, 0)
        sid = jnp.where(j < total, seg, -1)
        return pos.astype(jnp.float32), sid.astype(jnp.int32)

    return jax.vmap(per_row)(lengths)


# ---------------------------------------------------------------------------
# Feature permutation: grouped-halves layout for q/k (lane e = [group g][head i][k]).
# Original head-major feature for grouped lane e is  i*h + g*(h/2) + k.
# ---------------------------------------------------------------------------
def _grouped_feature_perm(n, h):
    e = jnp.arange(n * h, dtype=jnp.int32)
    g = e // (n * h // 2)
    rem = e % (n * h // 2)
    i = rem // (h // 2)
    k = rem % (h // 2)
    return i * h + g * (h // 2) + k


def _pick_row_tile(L, D, itemsize):
    # Keep each (TL, D) block <= ~1 MiB so q/k/oq/ok double-buffers stay far inside
    # scoped VMEM on v5e/v6e/v7x while still amortizing per-step grid overhead.
    max_rows = max(8, (1 << 20) // max(1, D * itemsize))
    for cand in (1024, 512, 256, 128, 64, 32, 16, 8):
        if cand <= max_rows and L % cand == 0:
            return cand
    return L  # fall back to a single full-L block (block dim == full array dim is legal)


# ---------------------------------------------------------------------------
# Pallas kernel 1: multi-sequence RoPE applied to q and k together.
# Blocks: pos (1, TL, 1), invf (1, D), q/k/out (1, TL, D) with D = n*h (lane-dense).
# ---------------------------------------------------------------------------
def _rope_qk_kernel(pos_ref, invf_ref, q_ref, k_ref, oq_ref, ok_ref, *, q_scale):
    pos = pos_ref[0]            # (TL, 1) f32 positions for this tile
    invf = invf_ref[...]        # (1, D)  f32 signed inv_freq (grouped-halves layout)

    emb = pos * invf            # (TL, D)
    cos = jnp.cos(emb)          # cos is even -> sign in invf drops out
    sin_s = jnp.sin(emb)        # sin is odd  -> carries the rotate_half sign
    D = emb.shape[-1]

    def apply(x_ref, o_ref, scale):
        x = x_ref[0].astype(jnp.float32)                 # (TL, D)
        # rotate_half partner lane: shift by D/2 is self-inverse -> XLU lane roll.
        partner = pltpu.roll(x, shift=D // 2, axis=1)
        y = x * cos + partner * sin_s
        if scale != 1.0:
            y = y * scale
        o_ref[0] = y.astype(o_ref.dtype)

    apply(q_ref, oq_ref, q_scale)   # q gets the head_dim**-0.5 scale (module semantics)
    apply(k_ref, ok_ref, 1.0)


def rope_qk_pallas(q_g, k_g, positions, num_heads, head_dim, *, base=10000, q_scale=1.0):
    """RoPE on q and k, both given in the grouped-halves folded layout (B, L, n*h)."""
    B, L, D = q_g.shape
    n, h = num_heads, head_dim
    assert D == n * h and h % 2 == 0, "head_dim must be even and D == n*h"

    inv_freq = 1.0 / (base ** (jnp.arange(0, h, 2, dtype=jnp.float32) / h))  # (h/2,)
    inv_lane = jnp.tile(inv_freq, 2 * n)                                     # (D,) grouped
    sign = jnp.concatenate([jnp.full((D // 2,), -1.0, jnp.float32),
                            jnp.ones((D // 2,), jnp.float32)])
    inv_signed = (inv_lane * sign).reshape(1, D)

    pos3 = positions.reshape(B, L, 1).astype(jnp.float32)

    itemsize = q_g.dtype.itemsize
    TL = _pick_row_tile(L, D, itemsize)
    grid = (B, L // TL)

    cost = pl.CostEstimate(
        flops=int(8 * B * L * D),
        transcendentals=int(2 * B * L * D),
        bytes_accessed=int(4 * B * L * D * itemsize + B * L * 4 + D * 4),
    )

    blk_pos = pl.BlockSpec((1, TL, 1), lambda b, l: (b, l, 0))
    blk_inv = pl.BlockSpec((1, D), lambda b, l: (0, 0))
    blk_x = pl.BlockSpec((1, TL, D), lambda b, l: (b, l, 0))

    kern = functools.partial(_rope_qk_kernel, q_scale=float(q_scale))
    q_rot, k_rot = pl.pallas_call(
        kern,
        out_shape=(jax.ShapeDtypeStruct((B, L, D), q_g.dtype),
                   jax.ShapeDtypeStruct((B, L, D), k_g.dtype)),
        grid=grid,
        in_specs=[blk_pos, blk_inv, blk_x, blk_x],
        out_specs=(blk_x, blk_x),
        compiler_params=pltpu.CompilerParams(
            dimension_semantics=("parallel", "parallel"),
            vmem_limit_bytes=32 * 1024 * 1024,
        ),
        cost_estimate=cost,
    )(pos3, inv_signed, q_g, k_g)
    return q_rot, k_rot


# ---------------------------------------------------------------------------
# Pallas kernel 2: per-segment (varlen) attention, one batch element per grid step.
# Equivalent to flash_attn_varlen on the unpadded concatenated sequences:
# attention only within the same segment; padded rows produce zeros.
# ---------------------------------------------------------------------------
def _seg_attn_kernel(segc_ref, segr_ref, q_ref, k_ref, v_ref, o_ref, *, sm_scale, causal):
    segc = segc_ref[0]                        # (L, 1) int32 segment id (-1 = padding)
    segr = segr_ref[0]                        # (1, L) int32
    q = q_ref[0].astype(jnp.float32)          # (n, L, h)
    k = k_ref[0].astype(jnp.float32)
    v = v_ref[0].astype(jnp.float32)
    L = q.shape[1]

    s = jnp.einsum("nqd,nkd->nqk", q, k,
                   preferred_element_type=jnp.float32) * sm_scale          # (n, L, L)
    mask = (segc == segr) & (segc >= 0) & (segr >= 0)                       # (L, L)
    if causal:
        row = jax.lax.broadcasted_iota(jnp.int32, (L, L), 0)
        col = jax.lax.broadcasted_iota(jnp.int32, (L, L), 1)
        mask = mask & (col <= row)
    s = jnp.where(mask[None, :, :], s, -1e30)

    m = jnp.max(s, axis=-1, keepdims=True)
    p = jnp.exp(s - m)
    l = jnp.sum(p, axis=-1, keepdims=True)
    o = jnp.einsum("nqk,nkd->nqd", p, v, preferred_element_type=jnp.float32) / l
    o = jnp.where(segc[None, :, :] >= 0, o, 0.0)   # zero padded rows (matches pad_input)
    o_ref[0] = o.astype(o_ref.dtype)


def seg_attention_pallas(qh, kh, vh, seg_id, *, sm_scale, causal=False):
    # TODO(synk): for long L, tile the KV axis with an online-softmax (flash)
    # accumulator instead of materializing (n, L, L) scores per batch element.
    B, n, L, h = qh.shape
    segc = seg_id.reshape(B, L, 1).astype(jnp.int32)
    segr = seg_id.reshape(B, 1, L).astype(jnp.int32)

    itemsize = qh.dtype.itemsize
    cost = pl.CostEstimate(
        flops=int(4 * B * n * L * L * h),
        transcendentals=int(B * n * L * L),
        bytes_accessed=int(4 * B * n * L * h * itemsize + 2 * B * L * 4),
    )

    blk_qkv = pl.BlockSpec((1, n, L, h), lambda b: (b, 0, 0, 0))
    kern = functools.partial(_seg_attn_kernel, sm_scale=float(sm_scale), causal=bool(causal))
    return pl.pallas_call(
        kern,
        out_shape=jax.ShapeDtypeStruct((B, n, L, h), qh.dtype),
        grid=(B,),
        in_specs=[pl.BlockSpec((1, L, 1), lambda b: (b, 0, 0)),
                  pl.BlockSpec((1, 1, L), lambda b: (b, 0, 0)),
                  blk_qkv, blk_qkv, blk_qkv],
        out_specs=blk_qkv,
        compiler_params=pltpu.CompilerParams(
            dimension_semantics=("parallel",),
            vmem_limit_bytes=32 * 1024 * 1024,
        ),
        cost_estimate=cost,
    )(segc, segr, qh, kh, vh)


# ---------------------------------------------------------------------------
# Module-equivalent forward.
# ---------------------------------------------------------------------------
def multi_sequence_mhsa_forward(hidden_states, attention_mask_in_length, params,
                                num_heads, causal=False):
    # TODO(synk): attention dropout (dropout_p > 0) is not implemented; module default is 0.0.
    B, L, H = hidden_states.shape
    n = num_heads
    h = H // n
    assert n * h == H and h % 2 == 0

    # qkv projection with q/k output rows permuted into the grouped-halves layout the
    # RoPE kernel expects. Attention scores are invariant to a consistent permutation
    # of q/k head features, so the module output is unchanged. v stays in original order.
    perm = _grouped_feature_perm(n, h)
    w, b = params["w_qkv"], params["b_qkv"]
    w_all = jnp.concatenate([w[:H][perm], w[H:2 * H][perm], w[2 * H:]], axis=0)
    b_all = jnp.concatenate([b[:H][perm], b[H:2 * H][perm], b[2 * H:]], axis=0)
    qkv = hidden_states @ w_all.T + b_all                     # (B, L, 3H)
    q_g, k_g, v_flat = jnp.split(qkv, 3, axis=-1)

    positions, seg_id = _positions_and_segments(attention_mask_in_length)

    # RoPE on q (with head_dim**-0.5 scale, as the module scales q before RoPE) and k.
    q_rot_g, k_rot_g = rope_qk_pallas(q_g, k_g, positions, n, h, q_scale=h ** -0.5)

    # head-major layouts for attention (original within-head feature order restored).
    def grouped_to_head_major(x):
        return x.reshape(B, L, 2, n, h // 2).transpose(0, 3, 1, 2, 4).reshape(B, n, L, h)

    qh = grouped_to_head_major(q_rot_g)
    kh = grouped_to_head_major(k_rot_g)
    vh = v_flat.reshape(B, L, n, h).transpose(0, 2, 1, 3)

    # flash_attn default softmax scale (head_dim**-0.5) applied on top of the q scale,
    # exactly as in the reference module.
    out = seg_attention_pallas(qh, kh, vh, seg_id, sm_scale=h ** -0.5, causal=causal)
    out = out.transpose(0, 2, 1, 3).reshape(B, L, H)
    return out @ params["w_out"].T + params["b_out"]


# ---------------------------------------------------------------------------
# Pure-JAX reference (mirrors the torch forward) for verification.
# ---------------------------------------------------------------------------
def reference_forward(hidden_states, index_tensor, params, num_heads, causal=False):
    B, L, H = hidden_states.shape
    n = num_heads
    h = H // n
    qkv = hidden_states @ params["w_qkv"].T + params["b_qkv"]
    qkv = qkv.reshape(B, L, 3, n, h)
    q, k, v = qkv[:, :, 0], qkv[:, :, 1], qkv[:, :, 2]
    q = q * (h ** -0.5)

    positions, seg = _positions_and_segments_ref(index_tensor)
    inv_freq = 1.0 / (10000.0 ** (jnp.arange(0, h, 2, dtype=jnp.float32) / h))
    freqs = jnp.einsum("bl,d->bld", positions, inv_freq)
    emb = jnp.concatenate([freqs, freqs], axis=-1)
    cos = jnp.cos(emb)[:, :, None, :]
    sin = jnp.sin(emb)[:, :, None, :]

    def rot_half(x):
        x1, x2 = x[..., : h // 2], x[..., h // 2:]
        return jnp.concatenate([-x2, x1], axis=-1)

    qr = q * cos + rot_half(q) * sin
    kr = k * cos + rot_half(k) * sin

    s = jnp.einsum("blnd,bmnd->bnlm", qr, kr) * (h ** -0.5)
    valid = seg >= 0
    mask = (seg[:, :, None] == seg[:, None, :]) & valid[:, :, None] & valid[:, None, :]
    if causal:
        mask = mask & jnp.tril(jnp.ones((L, L), dtype=bool))[None]
    s = jnp.where(mask[:, None, :, :], s, -1e30)
    p = jax.nn.softmax(s, axis=-1)
    o = jnp.einsum("bnlm,bmnd->blnd", p, v)
    o = jnp.where(valid[:, :, None, None], o, 0.0)
    return o.reshape(B, L, H) @ params["w_out"].T + params["b_out"]


if __name__ == "__main__":
    B, L = 2, 8
    num_heads, head_dim = 4, 32
    hidden = num_heads * head_dim   # 128

    key = jax.random.PRNGKey(0)
    kx, kw1, kb1, kw2, kb2 = jax.random.split(key, 5)
    hidden_states = jax.random.normal(kx, (B, L, hidden), dtype=jnp.float32)
    params = {
        "w_qkv": jax.random.normal(kw1, (3 * hidden, hidden), jnp.float32) * hidden ** -0.5,
        "b_qkv": jax.random.normal(kb1, (3 * hidden,), jnp.float32) * 0.02,
        "w_out": jax.random.normal(kw2, (hidden, hidden), jnp.float32) * hidden ** -0.5,
        "b_out": jax.random.normal(kb2, (hidden,), jnp.float32) * 0.02,
    }
    # per-example sequence lengths (zero padded), sums <= L
    index_tensor = jnp.array([[3, 4, 0, 0, 0, 0, 0, 0],
                              [2, 5, 0, 0, 0, 0, 0, 0]], dtype=jnp.int32)

    fwd = jax.jit(functools.partial(multi_sequence_mhsa_forward, num_heads=num_heads))
    out = jax.block_until_ready(fwd(hidden_states, index_tensor, params))

    ref = reference_forward(hidden_states, index_tensor, params, num_heads)
    assert out.shape == (B, L, hidden) and out.dtype == hidden_states.dtype
    err = float(jnp.max(jnp.abs(out - ref)))
    assert jnp.allclose(out, ref, atol=2e-3, rtol=2e-3), (
        f"Pallas MultiSequenceMHSA mismatch vs reference: max abs err {err}")

    print("KERNEL_OK")
</pallas_src>

<mosaic_0001>
module attributes {stable_mosaic.version = 11 : i64} {
  func.func @_rope_qk_kernel(%arg0: i32, %arg1: i32, %arg2: memref<1x8x1xf32, #tpu.memory_space<vmem>>, %arg3: memref<1x128xf32, #tpu.memory_space<vmem>>, %arg4: memref<1x8x128xf32, #tpu.memory_space<vmem>>, %arg5: memref<1x8x128xf32, #tpu.memory_space<vmem>>, %arg6: memref<1x8x128xf32, #tpu.memory_space<vmem>>, %arg7: memref<1x8x128xf32, #tpu.memory_space<vmem>>) attributes {dimension_semantics = [#tpu.dimension_semantics<parallel>, #tpu.dimension_semantics<parallel>], iteration_bounds = array<i64: 2, 1>, scalar_prefetch = 0 : i64, scratch_operands = 0 : i64, tpu.core_type = #tpu.core_type<tc>, window_params = [{transform_indices = @transform_0, window_bounds = array<i64: 1, 8, 1>}, {pipeline_mode = #tpu.pipeline_mode<synchronous>, transform_indices = @transform_1, window_bounds = array<i64: 1, 128>}, {transform_indices = @transform_2, window_bounds = array<i64: 1, 8, 128>}, {transform_indices = @transform_3, window_bounds = array<i64: 1, 8, 128>}, {transform_indices = @transform_4, window_bounds = array<i64: 1, 8, 128>}, {transform_indices = @transform_5, window_bounds = array<i64: 1, 8, 128>}]} {
    %c0 = arith.constant 0 : index
    %c0_0 = arith.constant 0 : index
    %c0_1 = arith.constant 0 : index
    %0 = vector.load %arg2[%c0, %c0_0, %c0_1] : memref<1x8x1xf32, #tpu.memory_space<vmem>>, vector<1x8x1xf32>
    %1 = vector.shape_cast %0 : vector<1x8x1xf32> to vector<8x1xf32>
    %c0_2 = arith.constant 0 : index
    %c0_3 = arith.constant 0 : index
    %2 = vector.load %arg3[%c0_2, %c0_3] : memref<1x128xf32, #tpu.memory_space<vmem>>, vector<1x128xf32>
    %3 = vector.broadcast %1 : vector<8x1xf32> to vector<8x128xf32>
    %4 = vector.broadcast %2 : vector<1x128xf32> to vector<8x128xf32>
    %5 = arith.mulf %3, %4 : vector<8x128xf32>
    %6 = math.cos %5 : vector<8x128xf32>
    %7 = math.sin %5 : vector<8x128xf32>
    %c0_4 = arith.constant 0 : index
    %c0_5 = arith.constant 0 : index
    %c0_6 = arith.constant 0 : index
    %8 = vector.load %arg4[%c0_4, %c0_5, %c0_6] : memref<1x8x128xf32, #tpu.memory_space<vmem>>, vector<1x8x128xf32>
    %9 = vector.shape_cast %8 : vector<1x8x128xf32> to vector<8x128xf32>
    %c64_i32 = arith.constant 64 : i32
    %10 = tpu.dynamic_rotate %9 by %c64_i32 dim 1 : vector<8x128xf32>, i32 -> vector<8x128xf32>
    %11 = arith.mulf %9, %6 : vector<8x128xf32>
    %12 = arith.mulf %10, %7 : vector<8x128xf32>
    %13 = arith.addf %11, %12 : vector<8x128xf32>
    %cst = arith.constant 0.176776692 : f32
    %14 = vector.broadcast %cst : f32 to vector<8x128xf32>
    %15 = arith.mulf %13, %14 : vector<8x128xf32>
    %c0_7 = arith.constant 0 : index
    %c0_8 = arith.constant 0 : index
    %c0_9 = arith.constant 0 : index
    %16 = vector.load %arg6[%c0_7, %c0_8, %c0_9] : memref<1x8x128xf32, #tpu.memory_space<vmem>>, vector<1x8x128xf32>
    %17 = vector.shape_cast %16 : vector<1x8x128xf32> to vector<8x128xf32>
    %18 = vector.shape_cast %15 : vector<8x128xf32> to vector<1x8x128xf32>
    tpu.vector_store %arg6[%c0_7, %c0_8, %c0_9], %18 {strides = array<i32>} : memref<1x8x128xf32, #tpu.memory_space<vmem>>, vector<1x8x128xf32>,
    %c0_10 = arith.constant 0 : index
    %c0_11 = arith.constant 0 : index
    %c0_12 = arith.constant 0 : index
    %19 = vector.load %arg5[%c0_10, %c0_11, %c0_12] : memref<1x8x128xf32, #tpu.memory_space<vmem>>, vector<1x8x128xf32>
    %20 = vector.shape_cast %19 : vector<1x8x128xf32> to vector<8x128xf32>
    %c64_i32_13 = arith.constant 64 : i32
    %21 = tpu.dynamic_rotate %20 by %c64_i32_13 dim 1 : vector<8x128xf32>, i32 -> vector<8x128xf32>
    %22 = arith.mulf %20, %6 : vector<8x128xf32>
    %23 = arith.mulf %21, %7 : vector<8x128xf32>
    %24 = arith.addf %22, %23 : vector<8x128xf32>
    %c0_14 = arith.constant 0 : index
    %c0_15 = arith.constant 0 : index
    %c0_16 = arith.constant 0 : index
    %25 = vector.load %arg7[%c0_14, %c0_15, %c0_16] : memref<1x8x128xf32, #tpu.memory_space<vmem>>, vector<1x8x128xf32>
    %26 = vector.shape_cast %25 : vector<1x8x128xf32> to vector<8x128xf32>
    %27 = vector.shape_cast %24 : vector<8x128xf32> to vector<1x8x128xf32>
    tpu.vector_store %arg7[%c0_14, %c0_15, %c0_16], %27 {strides = array<i32>} : memref<1x8x128xf32, #tpu.memory_space<vmem>>, vector<1x8x128xf32>,
    return
  }
  func.func @transform_0(%arg0: i32, %arg1: i32) -> (i32, i32, i32) {
    %c0_i32 = arith.constant 0 : i32
    %c0_i32_0 = arith.constant 0 : i32
    return %arg0, %arg1, %c0_i32 : i32, i32, i32
  }
  func.func @transform_1(%arg0: i32, %arg1: i32) -> (i32, i32) {
    %c0_i32 = arith.constant 0 : i32
    %c0_i32_0 = arith.constant 0 : i32
    %c0_i32_1 = arith.constant 0 : i32
    return %c0_i32, %c0_i32_0 : i32, i32
  }
  func.func @transform_2(%arg0: i32, %arg1: i32) -> (i32, i32, i32) {
    %c0_i32 = arith.constant 0 : i32
    %c0_i32_0 = arith.constant 0 : i32
    return %arg0, %arg1, %c0_i32 : i32, i32, i32
  }
  func.func @transform_3(%arg0: i32, %arg1: i32) -> (i32, i32, i32) {
    %c0_i32 = arith.constant 0 : i32
    %c0_i32_0 = arith.constant 0 : i32
    return %arg0, %arg1, %c0_i32 : i32, i32, i32
  }
  func.func @transform_4(%arg0: i32, %arg1: i32) -> (i32, i32, i32) {
    %c0_i32 = arith.constant 0 : i32
    %c0_i32_0 = arith.constant 0 : i32
    return %arg0, %arg1, %c0_i32 : i32, i32, i32
  }
  func.func @transform_5(%arg0: i32, %arg1: i32) -> (i32, i32, i32) {
    %c0_i32 = arith.constant 0 : i32
    %c0_i32_0 = arith.constant 0 : i32
    return %arg0, %arg1, %c0_i32 : i32, i32, i32
  }
}

module attributes {stable_mosaic.version = 11 : i64} {
  func.func @_seg_attn_kernel(%arg0: i32, %arg1: memref<1x8x1xi32, #tpu.memory_space<vmem>>, %arg2: memref<1x1x8xi32, #tpu.memory_space<vmem>>, %arg3: memref<1x4x8x32xf32, #tpu.memory_space<vmem>>, %arg4: memref<1x4x8x32xf32, #tpu.memory_space<vmem>>, %arg5: memref<1x4x8x32xf32, #tpu.memory_space<vmem>>, %arg6: memref<1x4x8x32xf32, #tpu.memory_space<vmem>>) attributes {dimension_semantics = [#tpu.dimension_semantics<parallel>], iteration_bounds = array<i64: 2>, scalar_prefetch = 0 : i64, scratch_operands = 0 : i64, tpu.core_type = #tpu.core_type<tc>, window_params = [{transform_indices = @transform_0, window_bounds = array<i64: 1, 8, 1>}, {transform_indices = @transform_1, window_bounds = array<i64: 1, 1, 8>}, {transform_indices = @transform_2, window_bounds = array<i64: 1, 4, 8, 32>}, {transform_indices = @transform_3, window_bounds = array<i64: 1, 4, 8, 32>}, {transform_indices = @transform_4, window_bounds = array<i64: 1, 4, 8, 32>}, {transform_indices = @transform_5, window_bounds = array<i64: 1, 4, 8, 32>}]} {
    %c0 = arith.constant 0 : index
    %c0_0 = arith.constant 0 : index
    %c0_1 = arith.constant 0 : index
    %0 = vector.load %arg1[%c0, %c0_0, %c0_1] : memref<1x8x1xi32, #tpu.memory_space<vmem>>, vector<1x8x1xi32>
    %1 = vector.shape_cast %0 : vector<1x8x1xi32> to vector<8x1xi32>
    %c0_2 = arith.constant 0 : index
    %c0_3 = arith.constant 0 : index
    %c0_4 = arith.constant 0 : index
    %2 = vector.load %arg2[%c0_2, %c0_3, %c0_4] : memref<1x1x8xi32, #tpu.memory_space<vmem>>, vector<1x1x8xi32>
    %3 = vector.shape_cast %2 : vector<1x1x8xi32> to vector<1x8xi32>
    %c0_5 = arith.constant 0 : index
    %c0_6 = arith.constant 0 : index
    %c0_7 = arith.constant 0 : index
    %c0_8 = arith.constant 0 : index
    %4 = vector.load %arg3[%c0_5, %c0_6, %c0_7, %c0_8] : memref<1x4x8x32xf32, #tpu.memory_space<vmem>>, vector<1x4x8x32xf32>
    %5 = vector.shape_cast %4 : vector<1x4x8x32xf32> to vector<4x8x32xf32>
    %c0_9 = arith.constant 0 : index
    %c0_10 = arith.constant 0 : index
    %c0_11 = arith.constant 0 : index
    %c0_12 = arith.constant 0 : index
    %6 = vector.load %arg4[%c0_9, %c0_10, %c0_11, %c0_12] : memref<1x4x8x32xf32, #tpu.memory_space<vmem>>, vector<1x4x8x32xf32>
    %7 = vector.shape_cast %6 : vector<1x4x8x32xf32> to vector<4x8x32xf32>
    %c0_13 = arith.constant 0 : index
    %c0_14 = arith.constant 0 : index
    %c0_15 = arith.constant 0 : index
    %c0_16 = arith.constant 0 : index
    %8 = vector.load %arg5[%c0_13, %c0_14, %c0_15, %c0_16] : memref<1x4x8x32xf32, #tpu.memory_space<vmem>>, vector<1x4x8x32xf32>
    %9 = vector.shape_cast %8 : vector<1x4x8x32xf32> to vector<4x8x32xf32>
    "tpu.trace_start"() <{level = 10 : i32, message = "nqd,nkd->nqk"}> : () -> ()
    %cst = arith.constant dense<0.000000e+00> : vector<4x8x8xf32>
    %10 = tpu.matmul %5, %7, %cst {dimension_numbers = #tpu.dot_dimension_numbers<[2], [2], [1], [1], [0, 0, 0, 1, 1, 1], [0], [0]>, precision = #tpu.contract_precision<fp32>} : vector<4x8x32xf32>, vector<4x8x32xf32>, vector<4x8x8xf32> -> vector<4x8x8xf32>
    "tpu.trace_stop"() : () -> ()
    %cst_17 = arith.constant 0.176776692 : f32
    %11 = vector.broadcast %cst_17 : f32 to vector<4x8x8xf32>
    %12 = arith.mulf %10, %11 : vector<4x8x8xf32>
    %13 = vector.broadcast %1 : vector<8x1xi32> to vector<8x8xi32>
    %14 = vector.broadcast %3 : vector<1x8xi32> to vector<8x8xi32>
    %15 = arith.cmpi eq, %13, %14 : vector<8x8xi32>
    %c0_i32 = arith.constant 0 : i32
    %16 = vector.broadcast %c0_i32 : i32 to vector<8x1xi32>
    %17 = arith.cmpi sge, %1, %16 : vector<8x1xi32>
    %18 = vector.broadcast %17 : vector<8x1xi1> to vector<8x8xi1>
    %19 = arith.andi %15, %18 : vector<8x8xi1>
    %c0_i32_18 = arith.constant 0 : i32
    %20 = vector.broadcast %c0_i32_18 : i32 to vector<1x8xi32>
    %21 = arith.cmpi sge, %3, %20 : vector<1x8xi32>
    %22 = vector.broadcast %21 : vector<1x8xi1> to vector<8x8xi1>
    %23 = arith.andi %19, %22 : vector<8x8xi1>
    %24 = vector.shape_cast %23 : vector<8x8xi1> to vector<1x8x8xi1>
    %cst_19 = arith.constant -1.000000e+30 : f32
    %25 = vector.shape_cast %24 : vector<1x8x8xi1> to vector<1x8x8xi1>
    %26 = vector.broadcast %25 : vector<1x8x8xi1> to vector<4x8x8xi1>
    %27 = vector.broadcast %cst_19 : f32 to vector<4x8x8xf32>
    %28 = arith.select %26, %12, %27 : vector<4x8x8xi1>, vector<4x8x8xf32>
    %cst_20 = arith.constant dense<0xFF800000> : vector<4x8xf32>
    %29 = vector.multi_reduction <maximumf>, %28, %cst_20 [2] : vector<4x8x8xf32> to vector<4x8xf32>
    %30 = vector.shape_cast %29 : vector<4x8xf32> to vector<4x8x1xf32>
    %31 = vector.broadcast %30 : vector<4x8x1xf32> to vector<4x8x8xf32>
    %32 = arith.subf %28, %31 : vector<4x8x8xf32>
    %33 = math.exp %32 : vector<4x8x8xf32>
    %cst_21 = arith.constant dense<0.000000e+00> : vector<4x8xf32>
    %34 = vector.multi_reduction <add>, %33, %cst_21 [2] : vector<4x8x8xf32> to vector<4x8xf32>
    %35 = vector.shape_cast %34 : vector<4x8xf32> to vector<4x8x1xf32>
    "tpu.trace_start"() <{level = 10 : i32, message = "nqk,nkd->nqd"}> : () -> ()
    %cst_22 = arith.constant dense<0.000000e+00> : vector<4x8x32xf32>
    %36 = tpu.matmul %33, %9, %cst_22 {dimension_numbers = #tpu.dot_dimension_numbers<[2], [1], [1], [2], [0, 0, 0, 1, 1, 2], [0], [0]>, precision = #tpu.contract_precision<fp32>} : vector<4x8x8xf32>, vector<4x8x32xf32>, vector<4x8x32xf32> -> vector<4x8x32xf32>
    "tpu.trace_stop"() : () -> ()
    %37 = vector.broadcast %35 : vector<4x8x1xf32> to vector<4x8x32xf32>
    %38 = arith.divf %36, %37 : vector<4x8x32xf32>
    %39 = vector.shape_cast %1 : vector<8x1xi32> to vector<1x8x1xi32>
    %c0_i32_23 = arith.constant 0 : i32
    %40 = vector.broadcast %c0_i32_23 : i32 to vector<1x8x1xi32>
    %41 = arith.cmpi sge, %39, %40 : vector<1x8x1xi32>
    %cst_24 = arith.constant 0.000000e+00 : f32
    %42 = vector.shape_cast %41 : vector<1x8x1xi1> to vector<1x8x1xi1>
    %43 = vector.broadcast %42 : vector<1x8x1xi1> to vector<4x8x32xi1>
    %44 = vector.broadcast %cst_24 : f32 to vector<4x8x32xf32>
    %45 = arith.select %43, %38, %44 : vector<4x8x32xi1>, vector<4x8x32xf32>
    %c0_25 = arith.constant 0 : index
    %c0_26 = arith.constant 0 : index
    %c0_27 = arith.constant 0 : index
    %c0_28 = arith.constant 0 : index
    %46 = vector.load %arg6[%c0_25, %c0_26, %c0_27, %c0_28] : memref<1x4x8x32xf32, #tpu.memory_space<vmem>>, vector<1x4x8x32xf32>
    %47 = vector.shape_cast %46 : vector<1x4x8x32xf32> to vector<4x8x32xf32>
    %48 = vector.shape_cast %45 : vector<4x8x32xf32> to vector<1x4x8x32xf32>
    tpu.vector_store %arg6[%c0_25, %c0_26, %c0_27, %c0_28], %48 {strides = array<i32>} : memref<1x4x8x32xf32, #tpu.memory_space<vmem>>, vector<1x4x8x32xf32>,
    return
  }
  func.func @transform_0(%arg0: i32) -> (i32, i32, i32) {
    %c0_i32 = arith.constant 0 : i32
    %c0_i32_0 = arith.constant 0 : i32
    %c0_i32_1 = arith.constant 0 : i32
    return %arg0, %c0_i32, %c0_i32_0 : i32, i32, i32
  }
  func.func @transform_1(%arg0: i32) -> (i32, i32, i32) {
    %c0_i32 = arith.constant 0 : i32
    %c0_i32_0 = arith.constant 0 : i32
    %c0_i32_1 = arith.constant 0 : i32
    return %arg0, %c0_i32, %c0_i32_0 : i32, i32, i32
  }
  func.func @transform_2(%arg0: i32) -> (i32, i32, i32, i32) {
    %c0_i32 = arith.constant 0 : i32
    %c0_i32_0 = arith.constant 0 : i32
    %c0_i32_1 = arith.constant 0 : i32
    %c0_i32_2 = arith.constant 0 : i32
    return %arg0, %c0_i32, %c0_i32_0, %c0_i32_1 : i32, i32, i32, i32
  }
  func.func @transform_3(%arg0: i32) -> (i32, i32, i32, i32) {
    %c0_i32 = arith.constant 0 : i32
    %c0_i32_0 = arith.constant 0 : i32
    %c0_i32_1 = arith.constant 0 : i32
    %c0_i32_2 = arith.constant 0 : i32
    return %arg0, %c0_i32, %c0_i32_0, %c0_i32_1 : i32, i32, i32, i32
  }
  func.func @transform_4(%arg0: i32) -> (i32, i32, i32, i32) {
    %c0_i32 = arith.constant 0 : i32
    %c0_i32_0 = arith.constant 0 : i32
    %c0_i32_1 = arith.constant 0 : i32
    %c0_i32_2 = arith.constant 0 : i32
    return %arg0, %c0_i32, %c0_i32_0, %c0_i32_1 : i32, i32, i32, i32
  }
  func.func @transform_5(%arg0: i32) -> (i32, i32, i32, i32) {
    %c0_i32 = arith.constant 0 : i32
    %c0_i32_0 = arith.constant 0 : i32
    %c0_i32_1 = arith.constant 0 : i32
    %c0_i32_2 = arith.constant 0 : i32
    return %arg0, %c0_i32, %c0_i32_0, %c0_i32_1 : i32, i32, i32, i32
  }
}

</mosaic_0001>

<bundles_post_ra>
// kernel: custom-call.4
= control target key start
LH: loop header
LB: loop body
LE: loop exit
PB: predicated region body
PF: predicated region fallthrough
CT: control target
= control target key end

     0   :  { %s6_s0 = inlined_call_operand.vmem [shape: u32[2,8], index: 0, kind: output, shape index: {}]  }

// kernel: squeeze.7
= control target key start
LH: loop header
LB: loop body
LE: loop exit
PB: predicated region body
PF: predicated region fallthrough
CT: control target
= control target key end

     0   :  { %vm8_vm0 = vcmask 64512   ;;  %s42_s0 = inlined_call_operand.vmem [shape: s32[16], index: 0, kind: input, shape index: {}]   ;;  %s43_s1 = inlined_call_operand.vmem [shape: s32[2,8], index: 1, kind: output, shape index: {}]  }
   0x1   :  { %v5_v0 = vld [vmem:[%s42_s0] sm:$0x1]  ;;  %s25_s0 = smov 120  }
   0x2   :  { %6 = vst [vmem:[#allocation1] sm:$0x1] %v5_v0 }
   0x9   :  { %v10_v1 = vld [vmem:[#allocation1] sm:$0x1]  }
   0xa   :  { %v7_v2 = vld [vmem:[#allocation1] sm:$0x1]   ;;  %11 = vrot.lane.b32.xlu0 %v10_v1, %s25_s0 }
   0xb   :  { %9 = vst.msk [vmem:[#allocation0] sm:$0x1] %vm8_vm0, %v7_v2  }
  0x7c   :  { %v12_v3 = vpop.permute.xlu0 %11  }
  0x7d   :  { %15 = vst.msk [vmem:[#allocation0 + $0x1] sm:$0x1] %vm8_vm0, %v12_v3  }
  0x84   :  { %v20_v4 = vld [vmem:[#allocation0] sm:$0x3] }
  0x85   :  { %23 = vst [vmem:[%s43_s1] sm:$0x3] %v20_v4 }

// kernel: sub.11
= control target key start
LH: loop header
LB: loop body
LE: loop exit
PB: predicated region body
PF: predicated region fallthrough
CT: control target
= control target key end

     0   :  { %s34_s0 = inlined_call_operand.vmem [shape: s32[2,8], index: 0, kind: input, shape index: {}]   ;;  %s35_s1 = inlined_call_operand.vmem [shape: s32[2,8], index: 1, kind: input, shape index: {}]   ;;  %s36_s2 = inlined_call_operand.vmem [shape: s32[2,8], index: 2, kind: output, shape index: {}]  }
   0x1   :  { %v3_v0 = vld [vmem:[%s34_s0] sm:$0x3] }
   0x2   :  { %v4_v1 = vld [vmem:[%s35_s1] sm:$0x3] }
   0x3   :  { %v7_v2 = vsub.s32 %v3_v0, %v4_v1 }
   0x5   :  { %9 = vst [vmem:[%s36_s2] sm:$0x3] %v7_v2 }

// kernel: multi_sequence_mhsa_forward.2
= control target key start
LH: loop header
LB: loop body
LE: loop exit
PB: predicated region body
PF: predicated region fallthrough
CT: control target
= control target key end

     0   :  { %s831_s18 = smov 0   ;;  %s833_s19 = smov 0   ;;  %s912_s0 = inlined_call_operand.vmem [shape: f32[2,8,1], index: 0, kind: input, shape index: {}]   ;;  %s913_s1 = inlined_call_operand.vmem [shape: f32[1,128], index: 1, kind: input, shape index: {}]   ;;  %s914_s2 = inlined_call_operand.vmem [shape: f32[2,8,128], index: 2, kind: input, shape index: {}]   ;;  %s915_s3 = inlined_call_operand.vmem [shape: f32[2,8,128], index: 3, kind: input, shape index: {}]   ;;  %s916_s4 = inlined_call_operand.vmem [shape: f32[2,8,128], index: 4, kind: output, shape index: {0}]   ;;  %s917_s5 = inlined_call_operand.vmem [shape: f32[2,8,128], index: 5, kind: output, shape index: {1}]  }
   0x1   :  { %s835_s20 = smov 0  }
   0x2 LB: > { %s28_s21 = sadd.s32 1, %s787_s19  ;;  %p711_p0 = scmp.ge.s32.totalorder %s791_s20, 1  ;;  %s791_s20 = sphi %s835_s20, %s16_s20   ;;  %s787_s19 = sphi %s833_s19, %s919_s19   ;;  %s783_s18 = sphi %s831_s18, %s918_s18  }
   0x3   : > { %p30_p1 = scmp.ge.s32.totalorder %s28_s21, 2  ;;  %p238_p2 = scmp.lt.s32.totalorder %s791_s20, 3 }
   0x5   : > { %s921_s21 = smov (%p30_p1, %s28_s21), 0  ;;  %p239_p3 = pnand %p711_p0, %p238_p2 }
   0x6   : > { %p291_p4 = scmp.lt.s32.totalorder (!%p239_p3), %s783_s18, 1  ;;  %s794_s7 = smov (!%p239_p3), 64  }
   0x7   : > { %242 = sbr.rel (%p239_p3) target bundleno = 231 (0xe7), region = 36 }
   0xc   : > { %v793_v0 = vmov 0   ;;  %s923_s18 = smov (!%p291_p4, %s783_s18), 1  ;;  %v717_v4 = vld [vmem:[%s913_s1] ss:$0 sm:$0xff]  ;;  %v795_v17 = vmov 683565275  }
   0xd   : > { %764 = vset.pattern.permute.xlu0 %v793_v0  ;;  %s849_s22 = sshll.u32 %s923_s18, 3  ;;  %v796_v19 = vmov 2475754826   ;;  %v797_v22 = vmov 2131351028  }
   0xe   : > { %s297_s25 = scalar_lea.vmem %s912_s0, %s849_s22  ;;  %s311_s28 = scalar_lea.vmem %s915_s3, %s849_s22  ;;  %v798_v25 = vmov 2102212464   ;;  %v799_v28 = vmov 920167782   ;;  %v800_v31 = vmov 1326507024  }
   0xf   : > { %v326_v1 = vld [vmem:[%s297_s25] sm:$0xff]  ;;  %s304_s6 = scalar_lea.vmem %s914_s2, %s849_s22  ;;  %s325_s12 = scalar_lea.vmem %s917_s5, %s849_s22 }
  0x10   : > { %v859_v2 = vld [vmem:[%s311_s28] sm:$0xff]  ;;  %330 = vperm.xlu0 %764, %v326_v1   ;;  %s318_s15 = scalar_lea.vmem %s916_s4, %s849_s22 }
  0x11   : > { %556 = vrot.lane.b32.xlu1 %v859_v2, %s794_s7  ;;  %v866_v3 = vld [vmem:[%s304_s6] sm:$0xff] }
  0x14   : > { %548 = vrot.lane.b32.xlu0 %v866_v3, %s794_s7 }
  0x8b   : > { %v331_v5 = vpop.permute.xlu0 %330 }
  0x8c   : > { %v872_v6 = vmul.f32 %v717_v4, %v331_v5 }
  0x8e   : > { %v343_v7 = vand.u32 2139095040, %v872_v6  ;;  %v340_v11 = vand.u32 2147483647, %v872_v6  ;;  %vm342_vm7 = vcmp.lt.s32.totalorder %v872_v6, 0  ;;  %vm432_vm15 = vweird.f32 %v872_v6 }
  0x90   : > { %v344_v8 = vshrl.u32 %v343_v7, 23  ;;  %v347_v14 = vand.u32 8388607, %v340_v11  ;;  %vm341_vm8 = vcmp.le.f32.partialorder %v340_v11, 0.7853982  ;;  %v557_v11 = vpop.permute.xlu1 %556 }
  0x92   : > { %v718_v9 = vadd.s32 4294967169, %v344_v8  ;;  %v348_v33 = vor.u32 8388608, %v347_v14 }
  0x94   : > { %v350_v10 = vadd.s32 1, %v718_v9  ;;  %v388_v47 = vshll.u32 %v348_v33, 8 }
  0x96   : > { %vm351_vm0 = vcmp.gt.s32.totalorder %v350_v10, 0 }
  0x97   : > { %v352_v12 = vsel %vm351_vm0, %v350_v10, 0 }
  0x98   : > { %v354_v13 = vand.u32 31, %v352_v12  ;;  %v353_v16 = vshrl.u32 %v352_v12, 5 }
  0x9a   : > { %v355_v15 = vsub.s32 32, %v354_v13  ;;  %v357_v18 = vshll.u32 %v795_v17, %v354_v13  ;;  %v360_v20 = vshll.u32 %v796_v19, %v354_v13  ;;  %v363_v24 = vshll.u32 %v797_v22, %v354_v13 }
  0x9b   : > { %v366_v27 = vshll.u32 %v798_v25, %v354_v13  ;;  %v369_v30 = vshll.u32 %v799_v28, %v354_v13  ;;  %vm372_vm1 = vcmp.lt.s32.totalorder %v353_v16, 1  ;;  %vm375_vm2 = vcmp.lt.s32.totalorder %v353_v16, 4 }
  0x9c   : > { %v358_v21 = vshrl.u32 %v796_v19, %v355_v15  ;;  %v361_v23 = vshrl.u32 %v797_v22, %v355_v15  ;;  %v364_v26 = vshrl.u32 %v798_v25, %v355_v15  ;;  %v367_v29 = vshrl.u32 %v799_v28, %v355_v15 }
  0x9d   : > { %v370_v32 = vshrl.u32 %v800_v31, %v355_v15  ;;  %v356_v42 = vshrl.u32 %v795_v17, %v355_v15  ;;  %vm374_vm3 = vcmp.lt.s32.totalorder %v353_v16, 3  ;;  %vm373_vm4 = vcmp.lt.s32.totalorder %v353_v16, 2 }
  0x9e   : > { %v359_v34 = vor.u32 %v358_v21, %v357_v18  ;;  %v362_v35 = vor.u32 %v361_v23, %v360_v20  ;;  %v365_v36 = vor.u32 %v364_v26, %v363_v24  ;;  %v368_v37 = vor.u32 %v367_v29, %v366_v27 }
  0x9f   : > { %v371_v38 = vor.u32 %v370_v32, %v369_v30 }
  0xa0   : > { %v377_v39 = vsel %vm375_vm2, %v365_v36, 2102212464  ;;  %v380_v40 = vsel %vm372_vm1, %v359_v34, %v362_v35  ;;  %v384_v41 = vsel %vm372_vm1, %v362_v35, %v365_v36  ;;  %v381_v43 = vsel %vm375_vm2, %v368_v37, 920167782 }
  0xa1   : > { %v385_v44 = vsel %vm375_vm2, %v371_v38, 1326507024  ;;  %v382_v45 = vsel %vm374_vm3, %v365_v36, %v381_v43  ;;  %v376_v48 = vsel %vm372_vm1, %v356_v42, %v359_v34  ;;  %v378_v49 = vsel %vm374_vm3, %v362_v35, %v377_v39  ;;  %v549_v39 = vpop.permute.xlu0 %548 }
  0xa2   : > { %v386_v46 = vsel %vm374_vm3, %v368_v37, %v385_v44  ;;  %v383_v50 = vsel %vm373_vm4, %v380_v40, %v382_v45  ;;  %v379_v56 = vsel %vm373_vm4, %v376_v48, %v378_v49 }
  0xa3   : > { %v387_v51 = vsel %vm373_vm4, %v384_v41, %v386_v46  ;;  %v881_v54 = vmul.u32.u64.low %v388_v47, %v383_v50  ;;  %v882_v55 = vmul.u32.u64.high %v388_v47, %v383_v50, %v881_v54  ;;  %v395_v58 = vmul.u32 %v388_v47, %v379_v56 }
  0xa4   : > { %v878_v52 = vmul.u32.u64.low %v388_v47, %v387_v51  ;;  %v879_v53 = vmul.u32.u64.high %v388_v47, %v387_v51, %v878_v52 }
  0xa5   : > { %v398_v57 = vadd.s32 1, %v882_v55 }
  0xa6   : > { %vm397_vm5 = vc.u32 %v879_v53, %v881_v54  ;;  %v396_v9 = vadd.s32 %v881_v54, %v879_v53 }
  0xa7   : > { %v399_v59 = vsel %vm397_vm5, %v398_v57, %v882_v55 }
  0xa8   : > { %v400_v60 = vadd.s32 %v399_v59, %v395_v58 }
  0xaa   : > { %v401_v61 = vadd.s32 536870912, %v400_v60 }
  0xac   : > { %v402_v62 = vshrl.u32 %v401_v61, 30 }
  0xae   : > { %v403_v63 = vshll.u32 %v402_v62, 30  ;;  %v426_v23 = vsub.s32 4, %v402_v62 }
  0xb0   : > { %v404_v0 = vsub.s32 %v400_v60, %v403_v63  ;;  %v427_v26 = vsel %vm342_vm7, %v426_v23, %v402_v62 }
  0xb1   : > { %v429_v27 = vsel %vm341_vm8, 0, %v427_v26 }
  0xb2   : > { %v406_v1 = vsub.s32 0, %v404_v0  ;;  %v536_v28 = vadd.s32 3, %v429_v27  ;;  %v433_v29 = vand.u32 3, %v429_v27 }
  0xb4   : > { %v719_v4 = vmin.u32 %v406_v1, %v404_v0  ;;  %v537_v30 = vand.u32 3, %v536_v28  ;;  %vm438_vm9 = vcmp.eq.s32.totalorder %v433_v29, 2  ;;  %vm435_vm11 = vcmp.eq.s32.totalorder %v433_v29, 0 }
  0xb5   : > { %vm434_vm13 = vcmp.lt.s32.totalorder %v433_v29, 2 }
  0xb6   : > { %v408_v5 = vclz %v719_v4  ;;  %vm542_vm10 = vcmp.eq.s32.totalorder %v537_v30, 2  ;;  %vm539_vm12 = vcmp.eq.s32.totalorder %v537_v30, 0  ;;  %vm538_vm14 = vcmp.lt.s32.totalorder %v537_v30, 2 }
  0xb8   : > { %v720_v7 = vadd.s32 4294967294, %v408_v5 }
  0xba   : > { %vm721_vm6 = vcmp.lt.s32.totalorder %v720_v7, 0 }
  0xbb   : > { %v411_v8 = vsel %vm721_vm6, 0, %v720_v7 }
  0xbc   : > { %v412_v10 = vsub.s32 32, %v411_v8  ;;  %v416_v12 = vsub.s32 4294967266, %v411_v8  ;;  %v413_v13 = vshll.u32 %v404_v0, %v411_v8 }
  0xbe   : > { %v414_v14 = vshrl.u32 %v396_v9, %v412_v10  ;;  %v417_v15 = vadd.s32 127, %v416_v12 }
  0xc0   : > { %v415_v16 = vor.u32 %v414_v14, %v413_v13  ;;  %v418_v17 = vshll.u32 %v417_v15, 23 }
  0xc2   : > { %v419_v18 = vor.u32 4788187, %v418_v17  ;;  %v422_v20 = vcvt.s32.f32 %v415_v16 }
  0xc4   : > { %v420_v19 = vand.u32 2147483647, %v419_v18 }
  0xc6   : > { %v423_v21 = vmul.f32 %v422_v20, %v420_v19 }
  0xc8   : > { %v424_v22 = vxor.u32 2147483648, %v423_v21 }
  0xca   : > { %v425_v24 = vsel %vm342_vm7, %v424_v22, %v423_v21 }
  0xcb   : > { %v428_v25 = vsel %vm341_vm8, %v872_v6, %v425_v24 }
  0xcc   : > { %765 = vcosq.f32 %v428_v25 }
  0xcd   : > { %767 = vsinq.f32 %v428_v25 }
  0xd9   : > { %v766_v31 = vpop.eup %765 }
  0xda   : > { %v768_v32 = vpop.eup %767  ;;  %v439_v33 = vxor.u32 2147483648, %v766_v31 }
  0xdb   : > { %v436_v34 = vxor.u32 2147483648, %v768_v32 }
  0xdc   : > { %v440_v35 = vsel %vm438_vm9, %v439_v33, %v768_v32  ;;  %v544_v36 = vsel %vm542_vm10, %v439_v33, %v768_v32 }
  0xdd   : > { %v437_v37 = vsel %vm435_vm11, %v766_v31, %v436_v34  ;;  %v541_v38 = vsel %vm539_vm12, %v766_v31, %v436_v34 }
  0xde   : > { %v441_v40 = vsel %vm434_vm13, %v437_v37, %v440_v35  ;;  %v545_v41 = vsel %vm538_vm14, %v541_v38, %v544_v36 }
  0xdf   : > { %v442_v42 = vsel %vm432_vm15, nan, %v441_v40  ;;  %v546_v43 = vsel %vm432_vm15, nan, %v545_v41 }
  0xe0   : > { %v558_v44 = vmul.f32 %v859_v2, %v442_v42  ;;  %v559_v45 = vmul.f32 %v557_v11, %v546_v43  ;;  %v550_v46 = vmul.f32 %v866_v3, %v442_v42  ;;  %v551_v47 = vmul.f32 %v549_v39, %v546_v43 }
  0xe2   : > { %v560_v48 = vadd.f32 %v559_v45, %v558_v44  ;;  %v552_v49 = vadd.f32 %v551_v47, %v550_v46 }
  0xe4   : > { %561 = vst [vmem:[%s325_s12] sm:$0xff] %v560_v48  ;;  %v553_v6 = vmul.f32 0.17677669, %v552_v49 }
  0xe6   : > { %554 = vst [vmem:[%s318_s15] sm:$0xff] %v553_v6 }
  0xe7 PF: > { %s16_s20 = sadd.s32 1, %s791_s20   ;;  %s918_s18 = smov %s787_s19 }
  0xe8   : > { %p13_p5 = scmp.ge.s32.totalorder %s16_s20, 4   ;;  %s919_s19 = smov %s921_s21 }
  0xea   :  { %15 = sbr.rel (!%p13_p5) target bundleno = 2 (0x2), region = 84 }

// kernel: multi_sequence_mhsa_forward.3
= control target key start
LH: loop header
LB: loop body
LE: loop exit
PB: predicated region body
PF: predicated region fallthrough
CT: control target
= control target key end

     0   :  { %s4526_s18 = smov 0   ;;  %s4895_s0 = inlined_call_operand.vmem [shape: s32[2,8,1], index: 0, kind: input, shape index: {}]   ;;  %s4896_s1 = inlined_call_operand.vmem [shape: s32[2,1,8], index: 1, kind: input, shape index: {}]   ;;  %s4897_s2 = inlined_call_operand.vmem [shape: f32[2,4,8,32], index: 2, kind: input, shape index: {}]   ;;  %s4898_s3 = inlined_call_operand.vmem [shape: f32[2,4,8,32], index: 3, kind: input, shape index: {}]   ;;  %s4899_s4 = inlined_call_operand.vmem [shape: f32[2,4,8,32], index: 4, kind: input, shape index: {}]   ;;  %s4900_s5 = inlined_call_operand.vmem [shape: f32[2,4,8,32], index: 5, kind: output, shape index: {}]  }
   0x1 LB: > { %s4101_s19 = sadd.s32 4294967295, %s4491_s18   ;;  %p4105_p0 = scmp.ge.s32.totalorder %s4491_s18, 1  ;;  %s4491_s18 = sphi %s4526_s18, %s15_s18  }
   0x2   : > { %p224_p1 = scmp.lt.s32.totalorder %s4491_s18, 3 }
   0x4   : > { %p225_p2 = pnand %p4105_p0, %p224_p1 }
   0x5   : > { %p269_p3 = scmp.lt.s32.totalorder (!%p225_p2), %s4101_s19, 1 }
   0x6   : > { %228 = sbr.rel (%p225_p2) target bundleno = 648 (0x288), region = 40 }
   0xb   : > { %v4493_v0 = vmov 0.0   ;;  %vm4494_vm0 = vmmov 0   ;;  %s4904_s19 = smov (!%p269_p3, %s4101_s19), 1  ;;  %v4495_v1 = vmov 0   ;;  %vm310_vm1 = vcmask 261120  }
   0xc   : > { %4217 = vmatprep.subr.mxu0 %v4493_v0  ;;  %4219 = vmatprep.mubr.msk.f32.mxu0 %vm4494_vm0, %v4493_v0  ;;  %s4544_s20 = sshll.u32 %s4904_s19, 5  ;;  %s4106_s21 = sshll.u32 %s4904_s19, 3  ;;  %v2126_v60 = vlaneseq  ;;  %vm2152_vm8 = vcmask 64512  }
   0xd   : > { %4222 = vmatprep.subr.mxu1 %v4493_v0  ;;  %4224 = vmatprep.mubr.msk.f32.mxu1 %vm4494_vm0, %v4493_v0  ;;  %s4551_s24 = scalar_lea.vmem %s4898_s3, %s4544_s20  ;;  %s4557_s27 = scalar_lea.vmem %s4897_s2, %s4544_s20 }
   0xe   : > { %4468 = vset.pattern.permute.xlu0 %v4495_v1  ;;  %v302_v2 = vld [vmem:[%s4551_s24] sm:$0xff]  ;;  %v303_v4 = vld [vmem:[%s4551_s24 + $0x8] sm:$0xff]  ;;  %s272_s30 = scalar_lea.vmem %s4895_s0, %s4106_s21  ;;  %v304_v25 = vld [vmem:[%s4551_s24 + $0x10] sm:$0xff]  ;;  %s275_s8 = scalar_lea.vmem %s4896_s1, %s4904_s19  ;;  %v2127_v61 = vshrl.u32 %v2126_v60, 7 }
   0xf   : > { %v298_v3 = vld [vmem:[%s4557_s27] sm:$0xff]  ;;  %v315_v5 = vsel %vm310_vm1, %v302_v2, 0  ;;  %v767_v7 = vsel %vm310_vm1, %v303_v4, 0  ;;  %v299_v8 = vld [vmem:[%s4557_s27 + $0x8] sm:$0xff]  ;;  %v300_v26 = vld [vmem:[%s4557_s27 + $0x10] sm:$0xff]  ;;  %v1219_v29 = vsel %vm310_vm1, %v304_v25, 0  ;;  %s4729_s11 = scalar_lea.vmem %s4899_s4, %s4544_s20  ;;  %s4874_s14 = scalar_lea.vmem %s4900_s5, %s4544_s20 }
  0x10   : > { %v312_v6 = vsel %vm310_vm1, %v298_v3, 0  ;;  %v348_v9 = vand.u32 4294901760, %v315_v5  ;;  %v764_v11 = vsel %vm310_vm1, %v299_v8, 0  ;;  %v296_v12 = vld [vmem:[%s272_s30] sm:$0xff]  ;;  %v4570_v15 = vand.u32 4294901760, %v767_v7  ;;  %v305_v40 = vld [vmem:[%s4551_s24 + $0x18] sm:$0xff] }
  0x11   : > { %v383_v10 = vand.u32 4294901760, %v312_v6  ;;  %v4572_v16 = vand.u32 4294901760, %v764_v11  ;;  %2124 = vperm.xlu0 %4468, %v296_v12   ;;  %vm2131_vm2 = vcmp.ge.s32.totalorder %v296_v12, 0  ;;  %v1216_v30 = vsel %vm310_vm1, %v300_v26, 0  ;;  %v301_v41 = vld [vmem:[%s4557_s27 + $0x18] sm:$0xff] }
  0x12   : > { %4218 = vmatpush3.xpose.msra.mxu0 %v348_v9  ;;  %v425_v14 = vsub.f32 %v315_v5, %v348_v9  ;;  %v4576_v21 = vsub.f32 %v767_v7, %v4570_v15  ;;  %v2132_v31 = vsel %vm2131_vm2, 1, %v4495_v1  ;;  %v4594_v34 = vand.u32 4294901760, %v1219_v29  ;;  %v297_v62 = vld [vmem:[%s275_s8] sm:$0x1] }
  0x13   : > { %v384_v13 = vsub.f32 %v312_v6, %v383_v10  ;;  %4227 = vmatprep.subr.mxu0 %v4493_v0  ;;  %v4579_v22 = vsub.f32 %v764_v11, %v4572_v16  ;;  %v4596_v35 = vand.u32 4294901760, %v1216_v30  ;;  %v1671_v44 = vsel %vm310_vm1, %v305_v40, 0 }
  0x14   : > { %v426_v18 = vand.u32 4294901760, %v425_v14  ;;  %v878_v28 = vand.u32 4294901760, %v4576_v21  ;;  %v1329_v38 = vsub.f32 %v1219_v29, %v4594_v34  ;;  %v1668_v45 = vsel %vm310_vm1, %v301_v41, 0 }
  0x15   : > { %v385_v17 = vand.u32 4294901760, %v384_v13  ;;  %v837_v27 = vand.u32 4294901760, %v4579_v22  ;;  %2134 = vperm.xlu0 %4468, %v2132_v31   ;;  %v4606_v39 = vsub.f32 %v1216_v30, %v4596_v35  ;;  %v4631_v48 = vand.u32 4294901760, %v1671_v44 }
  0x16   : > { %v427_v20 = vsub.f32 %v425_v14, %v426_v18  ;;  %v879_v33 = vsub.f32 %v4576_v21, %v878_v28  ;;  %v1330_v43 = vand.u32 4294901760, %v1329_v38  ;;  %v4633_v49 = vand.u32 4294901760, %v1668_v45 }
  0x17   : > { %v386_v19 = vsub.f32 %v384_v13, %v385_v17  ;;  %v838_v32 = vsub.f32 %v4579_v22, %v837_v27  ;;  %v1289_v42 = vand.u32 4294901760, %v4606_v39  ;;  %v1781_v52 = vsub.f32 %v1671_v44, %v4631_v48 }
  0x18   : > { %v428_v24 = vand.u32 4294901760, %v427_v20  ;;  %v880_v37 = vand.u32 4294901760, %v879_v33  ;;  %v1331_v47 = vsub.f32 %v1329_v38, %v1330_v43  ;;  %v1740_v53 = vsub.f32 %v1668_v45, %v4633_v49 }
  0x19   : > { %v387_v23 = vand.u32 4294901760, %v386_v19  ;;  %v839_v36 = vand.u32 4294901760, %v838_v32  ;;  %v1290_v46 = vsub.f32 %v4606_v39, %v1289_v42  ;;  %v1782_v55 = vand.u32 4294901760, %v1781_v52 }
  0x1a   : > { %4223 = vmatpush3.xpose.msra.mxu1 %v428_v24  ;;  %v1332_v51 = vand.u32 4294901760, %v1331_v47  ;;  %v1741_v54 = vand.u32 4294901760, %v1740_v53  ;;  %v2128_v3 = vsub.s32 0, %v2127_v61  ;;  %vm2138_vm3 = vcmp.ge.s32.totalorder %v297_v62, 0 }
  0x1b   : > { %4220 = vmatmul.mubr.f32.vlgmr.msra.gmra.mxu0 %v387_v23  ;;  %4232 = vmatprep.subr.mxu1 %v4493_v0  ;;  %v1291_v50 = vand.u32 4294901760, %v1290_v46  ;;  %v1783_v57 = vsub.f32 %v1781_v52, %v1782_v55 }
  0x1c   : > { %4228 = vmatpush3.xpose.msra.mxu0 %v425_v14  ;;  %4229 = vmatprep.mubr.msk.f32.mxu0 %vm4494_vm0, %v4493_v0  ;;  %v1742_v56 = vsub.f32 %v1740_v53, %v1741_v54 }
  0x1d   : > { %4237 = vmatprep.subr.mxu0 %v4493_v0  ;;  %4225 = vmatmul.mubr.f32.vlgmr.msra.gmra.mxu1 %v383_v10  ;;  %v1784_v59 = vand.u32 4294901760, %v1783_v57 }
  0x1e   : > { %4233 = vmatpush3.xpose.msra.mxu1 %v348_v9  ;;  %4234 = vmatprep.mubr.msk.f32.mxu1 %vm4494_vm0, %v4493_v0  ;;  %v1743_v58 = vand.u32 4294901760, %v1742_v56 }
  0x1f   : > { %4230 = vmatmul.mubr.f32.vlgmr.msra.gmra.mxu0 %v384_v13  ;;  %4242 = vmatprep.subr.mxu1 %v4493_v0 }
  0x20   : > { %4238 = vmatpush3.xpose.msra.mxu0 %v426_v18  ;;  %4239 = vmatprep.mubr.msk.f32.mxu0 %vm4494_vm0, %v4493_v0 }
  0x21   : > { %4235 = vmatmul.mubr.f32.vlgmr.msra.gmra.mxu1 %v385_v17  ;;  %4247 = vmatprep.subr.mxu0 %v4493_v0 }
  0x22   : > { %4243 = vmatpush3.xpose.msra.mxu1 %v348_v9  ;;  %4244 = vmatprep.mubr.msk.f32.mxu1 %vm4494_vm0, %v4493_v0  ;;  %v2129_v9 = vrot.slane %v297_v62, %v2128_v3 }
  0x23   : > { %4240 = vmatmul.mubr.f32.vlgmr.msra.gmra.mxu0 %v383_v10  ;;  %4252 = vmatprep.subr.mxu1 %v4493_v0 }
  0x24   : > { %4248 = vmatpush3.xpose.msra.mxu0 %v4570_v15  ;;  %4249 = vmatprep.mubr.msk.f32.mxu0 %vm4494_vm0, %v4493_v0 }
  0x25   : > { %4245 = vmatmul.mubr.f32.vlgmr.msra.gmra.mxu1 %v383_v10  ;;  %4257 = vmatprep.subr.mxu0 %v4493_v0  ;;  %v2139_v10 = vsel %vm2138_vm3, 1, %v4495_v1 }
  0x26   : > { %4253 = vmatpush3.xpose.msra.mxu1 %v880_v37  ;;  %4254 = vmatprep.mubr.msk.f32.mxu1 %vm4494_vm0, %v4493_v0  ;;  %v2143_v17 = vrot.slane %v2139_v10, %v2128_v3  ;;  %v306_v3 = vld [vmem:[%s4729_s11] sm:$0xff] }
  0x27   : > { %4250 = vmatmul.mubr.f32.vlgmr.msra.gmra.mxu0 %v839_v36  ;;  %4262 = vmatprep.subr.mxu1 %v4493_v0 }
  0x28   : > { %4258 = vmatpush3.xpose.msra.mxu0 %v4576_v21  ;;  %4259 = vmatprep.mubr.msk.f32.mxu0 %vm4494_vm0, %v4493_v0  ;;  %vm2144_vm7 = vcmp.eq.s32.totalorder %v2143_v17, 1 }
  0x29   : > { %4255 = vmatmul.mubr.f32.vlgmr.msra.gmra.mxu1 %v4572_v16  ;;  %4267 = vmatprep.subr.mxu0 %v4493_v0 }
  0x2a   : > { %4263 = vmatpush3.xpose.msra.mxu1 %v4570_v15  ;;  %4264 = vmatprep.mubr.msk.f32.mxu1 %vm4494_vm0, %v4493_v0 }
  0x2b   : > { %4260 = vmatmul.mubr.f32.vlgmr.msra.gmra.mxu0 %v4579_v22  ;;  %4272 = vmatprep.subr.mxu1 %v4493_v0 }
  0x2c   : > { %4268 = vmatpush3.xpose.msra.mxu0 %v878_v28  ;;  %4269 = vmatprep.mubr.msk.f32.mxu0 %vm4494_vm0, %v4493_v0 }
  0x2d   : > { %4265 = vmatmul.mubr.f32.vlgmr.msra.gmra.mxu1 %v837_v27  ;;  %4277 = vmatprep.subr.mxu0 %v4493_v0 }
  0x2e   : > { %4273 = vmatpush3.xpose.msra.mxu1 %v4570_v15  ;;  %4274 = vmatprep.mubr.msk.f32.mxu1 %vm4494_vm0, %v4493_v0 }
  0x2f   : > { %4270 = vmatmul.mubr.f32.vlgmr.msra.gmra.mxu0 %v4572_v16  ;;  %4282 = vmatprep.subr.mxu1 %v4493_v0 }
  0x30   : > { %4278 = vmatpush3.xpose.msra.mxu0 %v4594_v34  ;;  %4279 = vmatprep.mubr.msk.f32.mxu0 %vm4494_vm0, %v4493_v0 }
  0x31   : > { %4275 = vmatmul.mubr.f32.vlgmr.msra.gmra.mxu1 %v4572_v16  ;;  %4287 = vmatprep.subr.mxu0 %v4493_v0 }
  0x32   : > { %4283 = vmatpush3.xpose.msra.mxu1 %v1332_v51  ;;  %4284 = vmatprep.mubr.msk.f32.mxu1 %vm4494_vm0, %v4493_v0 }
  0x33   : > { %4280 = vmatmul.mubr.f32.vlgmr.msra.gmra.mxu0 %v1291_v50  ;;  %4292 = vmatprep.subr.mxu1 %v4493_v0 }
  0x34   : > { %4288 = vmatpush3.xpose.msra.mxu0 %v1329_v38  ;;  %4289 = vmatprep.mubr.msk.f32.mxu0 %vm4494_vm0, %v4493_v0 }
  0x35   : > { %4285 = vmatmul.mubr.f32.vlgmr.msra.gmra.mxu1 %v4596_v35  ;;  %4297 = vmatprep.subr.mxu0 %v4493_v0 }
  0x36   : > { %4293 = vmatpush3.xpose.msra.mxu1 %v4594_v34  ;;  %4294 = vmatprep.mubr.msk.f32.mxu1 %vm4494_vm0, %v4493_v0 }
  0x37   : > { %4290 = vmatmul.mubr.f32.vlgmr.msra.gmra.mxu0 %v4606_v39  ;;  %4302 = vmatprep.subr.mxu1 %v4493_v0 }
  0x38   : > { %4298 = vmatpush3.xpose.msra.mxu0 %v1330_v43  ;;  %4299 = vmatprep.mubr.msk.f32.mxu0 %vm4494_vm0, %v4493_v0 }
  0x39   : > { %4295 = vmatmul.mubr.f32.vlgmr.msra.gmra.mxu1 %v1289_v42  ;;  %4307 = vmatprep.subr.mxu0 %v4493_v0 }
  0x3a   : > { %4303 = vmatpush3.xpose.msra.mxu1 %v4594_v34  ;;  %4304 = vmatprep.mubr.msk.f32.mxu1 %vm4494_vm0, %v4493_v0 }
  0x3b   : > { %4300 = vmatmul.mubr.f32.vlgmr.msra.gmra.mxu0 %v4596_v35  ;;  %4312 = vmatprep.subr.mxu1 %v4493_v0 }
  0x3c   : > { %4308 = vmatpush3.xpose.msra.mxu0 %v4631_v48  ;;  %4309 = vmatprep.mubr.msk.f32.mxu0 %vm4494_vm0, %v4493_v0 }
  0x3d   : > { %4305 = vmatmul.mubr.f32.vlgmr.msra.gmra.mxu1 %v4596_v35  ;;  %4317 = vmatprep.subr.mxu0 %v4493_v0 }
  0x3e   : > { %4313 = vmatpush3.xpose.msra.mxu1 %v1784_v59  ;;  %4314 = vmatprep.mubr.msk.f32.mxu1 %vm4494_vm0, %v4493_v0 }
  0x3f   : > { %4310 = vmatmul.mubr.f32.vlgmr.msra.gmra.mxu0 %v1743_v58  ;;  %4322 = vmatprep.subr.mxu1 %v4493_v0 }
  0x40   : > { %4318 = vmatpush3.xpose.msra.mxu0 %v1781_v52  ;;  %4319 = vmatprep.mubr.msk.f32.mxu0 %vm4494_vm0, %v4493_v0 }
  0x41   : > { %4315 = vmatmul.mubr.f32.vlgmr.msra.gmra.mxu1 %v4633_v49  ;;  %4327 = vmatprep.subr.mxu0 %v4493_v0 }
  0x42   : > { %4323 = vmatpush3.xpose.msra.mxu1 %v4631_v48  ;;  %4324 = vmatprep.mubr.msk.f32.mxu1 %vm4494_vm0, %v4493_v0 }
  0x43   : > { %4320 = vmatmul.mubr.f32.vlgmr.msra.gmra.mxu0 %v1740_v53  ;;  %4332 = vmatprep.subr.mxu1 %v4493_v0 }
  0x44   : > { %4328 = vmatpush3.xpose.msra.mxu0 %v1782_v55  ;;  %4329 = vmatprep.mubr.msk.f32.mxu0 %vm4494_vm0, %v4493_v0 }
  0x45   : > { %4325 = vmatmul.mubr.f32.vlgmr.msra.gmra.mxu1 %v1741_v54  ;;  %4337 = vmatprep.subr.mxu0 %v4493_v0 }
  0x46   : > { %4333 = vmatpush3.xpose.msra.mxu1 %v4631_v48  ;;  %4334 = vmatprep.mubr.msk.f32.mxu1 %vm4494_vm0, %v4493_v0 }
  0x47   : > { %4330 = vmatmul.mubr.f32.vlgmr.msra.gmra.mxu0 %v4633_v49  ;;  %4342 = vmatprep.subr.mxu1 %v4493_v0 }
  0x48   : > { %4339 = vmatprep.mubr.msk.f32.mxu0 %vm4494_vm0, %v4493_v0 }
  0x49   : > { %4335 = vmatmul.mubr.f32.vlgmr.msra.gmra.mxu1 %v4633_v49 }
  0x4a   : > { %4344 = vmatprep.mubr.msk.f32.mxu1 %vm4494_vm0, %v4493_v0 }
  0x8c   : > { %v2125_v2 = vpop.permute.xlu0 %2124 }
  0x8d   : > { %vm2130_vm4 = vcmp.eq.s32.totalorder %v2125_v2, %v2129_v9 }
  0x90   : > { %v4707_v13 = vpop.permute.xlu0 %2134 }
  0x91   : > { %vm2136_vm5 = vcmp.eq.s32.totalorder %v4707_v13, 1 }
  0x92   : > { %vm2137_vm6 = vmand %vm2130_vm4, %vm2136_vm5 }
  0x93   : > { %vm4712_vm9 = vmand %vm2137_vm6, %vm2144_vm7 }
  0xdb   : > { %v389_v63 = vpop.f32.mrf.mxu0 }
  0xdd   : > { %v4221_v4 = vpop.f32.mrf.mxu0  ;;  %v465_v5 = vpop.f32.mrf.mxu1 }
  0xde   : > { %v466_v6 = vadd.f32 %v465_v5, %v389_v63 }
  0xdf   : > { %v539_v7 = vpop.f32.mrf.mxu0  ;;  %v4226_v8 = vpop.f32.mrf.mxu1 }
  0xe0   : > { %v540_v11 = vadd.f32 %v539_v7, %v466_v6  ;;  %v2223_v6 = vand.u32 4294901760, %v306_v3 }
  0xe1   : > { %v4231_v12 = vpop.f32.mrf.mxu0  ;;  %v613_v14 = vpop.f32.mrf.mxu1 }
  0xe2   : > { %v614_v15 = vadd.f32 %v613_v14, %v540_v11  ;;  %v4734_v11 = vsub.f32 %v306_v3, %v2223_v6  ;;  %4338 = vmatpush3.msra.mxu0 %v2223_v6 }
  0xe3   : > { %v687_v16 = vpop.f32.mrf.mxu0  ;;  %v4236_v18 = vpop.f32.mrf.mxu1  ;;  %4347 = vmatprep.subr.mxu0 %v4493_v0 }
  0xe4   : > { %v688_v19 = vadd.f32 %v687_v16, %v614_v15  ;;  %v2301_v17 = vand.u32 4294901760, %v4734_v11 }
  0xe5   : > { %v4241_v20 = vpop.f32.mrf.mxu0  ;;  %v759_v21 = vpop.f32.mrf.mxu1 }
  0xe6   : > { %v760_v22 = vadd.f32 %v759_v21, %v688_v19  ;;  %v2302_v21 = vsub.f32 %v4734_v11, %v2301_v17 }
  0xe7   : > { %v841_v23 = vpop.f32.mrf.mxu0  ;;  %v4246_v1 = vpop.f32.mrf.mxu1 }
  0xe8   : > { %v2119_v24 = vmul.f32 0.17677669, %v760_v22 }
  0xe9   : > { %v4251_v25 = vpop.f32.mrf.mxu0  ;;  %v917_v26 = vpop.f32.mrf.mxu1 }
  0xea   : > { %v918_v28 = vadd.f32 %v917_v26, %v841_v23  ;;  %v4718_v30 = vsel %vm4712_vm9, %v2119_v24, -1e+30  ;;  %v2303_v24 = vand.u32 4294901760, %v2302_v21 }
  0xeb   : > { %v991_v29 = vpop.f32.mrf.mxu0  ;;  %v4256_v31 = vpop.f32.mrf.mxu1  ;;  %v2153_v32 = vsel %vm2152_vm8, %v4718_v30, -inf }
  0xec   : > { %v992_v33 = vadd.f32 %v991_v29, %v918_v28  ;;  %2154 = vmax.xlane.f32.xlu1 %v2153_v32  ;;  %4343 = vmatpush3.msra.mxu1 %v2303_v24 }
  0xed   : > { %v4261_v34 = vpop.f32.mrf.mxu0  ;;  %v1065_v35 = vpop.f32.mrf.mxu1  ;;  %4352 = vmatprep.subr.mxu1 %v4493_v0 }
  0xee   : > { %v1066_v36 = vadd.f32 %v1065_v35, %v992_v33 }
  0xef   : > { %v1139_v37 = vpop.f32.mrf.mxu0  ;;  %v4266_v38 = vpop.f32.mrf.mxu1 }
  0xf0   : > { %v1140_v39 = vadd.f32 %v1139_v37, %v1066_v36  ;;  %v307_v36 = vld [vmem:[%s4729_s11 + $0x8] sm:$0xff] }
  0xf1   : > { %v4271_v40 = vpop.f32.mrf.mxu0  ;;  %v1211_v41 = vpop.f32.mrf.mxu1  ;;  %v4751_v38 = vand.u32 4294901760, %v307_v36 }
  0xf2   : > { %v1212_v42 = vadd.f32 %v1211_v41, %v1140_v39 }
  0xf3   : > { %v1293_v43 = vpop.f32.mrf.mxu0  ;;  %v4276_v44 = vpop.f32.mrf.mxu1  ;;  %v4754_v27 = vsub.f32 %v307_v36, %v4751_v38 }
  0xf4   : > { %v2120_v45 = vmul.f32 0.17677669, %v1212_v42 }
  0xf5   : > { %v4281_v46 = vpop.f32.mrf.mxu0  ;;  %v1369_v47 = vpop.f32.mrf.mxu1  ;;  %v2750_v44 = vand.u32 4294901760, %v4754_v27 }
  0xf6   : > { %v1370_v48 = vadd.f32 %v1369_v47, %v1293_v43  ;;  %v2149_v50 = vsel %vm4712_vm9, %v2120_v45, -1e+30  ;;  %v308_v46 = vld [vmem:[%s4729_s11 + $0x10] sm:$0xff] }
  0xf7   : > { %v1443_v49 = vpop.f32.mrf.mxu0  ;;  %v4286_v51 = vpop.f32.mrf.mxu1  ;;  %v2156_v52 = vsel %vm2152_vm8, %v2149_v50, -inf }
  0xf8   : > { %v1444_v53 = vadd.f32 %v1443_v49, %v1370_v48  ;;  %2157 = vmax.xlane.f32.xlu1 %v2156_v52  ;;  %v2751_v49 = vsub.f32 %v4754_v27, %v2750_v44  ;;  %v4766_v51 = vand.u32 4294901760, %v308_v46 }
  0xf9   : > { %v4291_v54 = vpop.f32.mrf.mxu0  ;;  %v1517_v55 = vpop.f32.mrf.mxu1 }
  0xfa   : > { %v1518_v56 = vadd.f32 %v1517_v55, %v1444_v53  ;;  %v2752_v55 = vand.u32 4294901760, %v2751_v49 }
  0xfb   : > { %v1591_v57 = vpop.f32.mrf.mxu0  ;;  %v4296_v58 = vpop.f32.mrf.mxu1 }
  0xfc   : > { %v1592_v59 = vadd.f32 %v1591_v57, %v1518_v56  ;;  %v4772_v56 = vsub.f32 %v308_v46, %v4766_v51 }
  0xfd   : > { %v4301_v60 = vpop.f32.mrf.mxu0  ;;  %v1663_v61 = vpop.f32.mrf.mxu1 }
  0xfe   : > { %v1664_v62 = vadd.f32 %v1663_v61, %v1592_v59  ;;  %v3199_v61 = vand.u32 4294901760, %v4772_v56 }
  0xff   : > { %v1745_v63 = vpop.f32.mrf.mxu0  ;;  %v4306_v2 = vpop.f32.mrf.mxu1 }
 0x100   : > { %v2121_v4 = vmul.f32 0.17677669, %v1664_v62 }
 0x101   : > { %v4311_v5 = vpop.f32.mrf.mxu0  ;;  %v1821_v7 = vpop.f32.mrf.mxu1 }
 0x102   : > { %v1822_v8 = vadd.f32 %v1821_v7, %v1745_v63  ;;  %v2150_v10 = vsel %vm4712_vm9, %v2121_v4, -1e+30  ;;  %v309_v63 = vld [vmem:[%s4729_s11 + $0x18] sm:$0xff]  ;;  %v3200_v5 = vsub.f32 %v4772_v56, %v3199_v61 }
 0x103   : > { %v1895_v9 = vpop.f32.mrf.mxu0  ;;  %v4316_v12 = vpop.f32.mrf.mxu1  ;;  %v2159_v14 = vsel %vm2152_vm8, %v2150_v10, -inf }
 0x104   : > { %v1896_v15 = vadd.f32 %v1895_v9, %v1822_v8  ;;  %2160 = vmax.xlane.f32.xlu0 %v2159_v14 }
 0x105   : > { %v4321_v16 = vpop.f32.mrf.mxu0  ;;  %v1969_v18 = vpop.f32.mrf.mxu1 }
 0x106   : > { %v1970_v19 = vadd.f32 %v1969_v18, %v1896_v15 }
 0x107   : > { %v2043_v20 = vpop.f32.mrf.mxu0  ;;  %v4326_v22 = vpop.f32.mrf.mxu1 }
 0x108   : > { %v2044_v23 = vadd.f32 %v2043_v20, %v1970_v19 }
 0x109   : > { %v4331_v1 = vpop.f32.mrf.mxu0  ;;  %v2115_v25 = vpop.f32.mrf.mxu1 }
 0x10a   : > { %v2116_v26 = vadd.f32 %v2115_v25, %v2044_v23 }
 0x10b   : > { %v4336_v28 = vpop.f32.mrf.mxu1 }
 0x10c   : > { %v2122_v29 = vmul.f32 0.17677669, %v2116_v26 }
 0x10e   : > { %v4745_v31 = vsel %vm4712_vm9, %v2122_v29, -1e+30 }
 0x10f   : > { %v2162_v32 = vsel %vm2152_vm8, %v4745_v31, -inf }
 0x110   : > { %2163 = vmax.xlane.f32.xlu1 %v2162_v32 }
 0x175   : > { %v2155_v33 = vpop.xlane.xlu1 %2154 }
 0x176   : > { %v2165_v34 = vsub.f32 %v4718_v30, %v2155_v33 }
 0x178   : > { %v2169_v35 = vmul.f32 1.442695, %v2165_v34 }
 0x17a   : > { %4469 = vpow2.f32 %v2169_v35 }
 0x181   : > { %v2158_v37 = vpop.xlane.xlu1 %2157 }
 0x182   : > { %v2166_v39 = vsub.f32 %v2149_v50, %v2158_v37 }
 0x184   : > { %v2171_v40 = vmul.f32 1.442695, %v2166_v39 }
 0x186   : > { %4471 = vpow2.f32 %v2171_v40 }
 0x187   : > { %v4470_v41 = vpop.eup %4469 }
 0x188   : > { %v2177_v42 = vsel %vm2152_vm8, %v4470_v41, 0.0  ;;  %v2190_v43 = vsel %vm2152_vm8, %v4470_v41, 0 }
 0x189   : > { %2178 = vadd.xlane.f32.xlu1 %v2177_v42  ;;  %v2258_v30 = vand.u32 4294901760, %v2190_v43 }
 0x18b   : > { %v2259_v45 = vsub.f32 %v2190_v43, %v2258_v30  ;;  %4345 = vmatmul.mubr.f32.vlgmr.msra.gmra.mxu1 %v2258_v30 }
 0x18c   : > { %4353 = vmatpush3.msra.mxu1 %v2223_v6  ;;  %4354 = vmatprep.mubr.msk.f32.mxu1 %vm4494_vm0, %v4493_v0 }
 0x18d   : > { %v2161_v47 = vpop.xlane.xlu0 %2160  ;;  %v2260_v48 = vand.u32 4294901760, %v2259_v45  ;;  %4362 = vmatprep.subr.mxu1 %v4493_v0 }
 0x18e   : > { %v2167_v50 = vsub.f32 %v2150_v10, %v2161_v47  ;;  %v3201_v10 = vand.u32 4294901760, %v3200_v5 }
 0x18f   : > { %4355 = vmatmul.mubr.f32.vlgmr.msra.gmra.mxu1 %v2260_v48  ;;  %v2261_v52 = vsub.f32 %v2259_v45, %v2260_v48 }
 0x190   : > { %v2173_v53 = vmul.f32 1.442695, %v2167_v50  ;;  %4363 = vmatpush3.msra.mxu1 %v2223_v6  ;;  %4364 = vmatprep.mubr.msk.f32.mxu1 %vm4494_vm0, %v4493_v0  ;;  %v4797_v6 = vand.u32 4294901760, %v309_v63 }
 0x191   : > { %v2262_v54 = vand.u32 4294901760, %v2261_v52  ;;  %4372 = vmatprep.subr.mxu1 %v4493_v0 }
 0x192   : > { %4473 = vpow2.f32 %v2173_v53 }
 0x193   : > { %v4472_v57 = vpop.eup %4471  ;;  %4340 = vmatmul.mubr.f32.vlgmr.msra.gmra.mxu0 %v2262_v54  ;;  %4365 = vmatmul.mubr.f32.vlgmr.msra.gmra.mxu1 %v2258_v30 }
 0x194   : > { %4348 = vmatpush3.msra.mxu0 %v4734_v11  ;;  %v2180_v58 = vsel %vm2152_vm8, %v4472_v57, 0.0  ;;  %4349 = vmatprep.mubr.msk.f32.mxu0 %vm4494_vm0, %v4493_v0  ;;  %v2639_v59 = vsel %vm2152_vm8, %v4472_v57, 0  ;;  %v4808_v11 = vsub.f32 %v309_v63, %v4797_v6 }
 0x195   : > { %2181 = vadd.xlane.f32.xlu1 %v2180_v58  ;;  %4373 = vmatpush3.msra.mxu1 %v2752_v55  ;;  %v2707_v60 = vand.u32 4294901760, %v2639_v59 }
 0x196   : > { %4374 = vmatprep.mubr.msk.f32.mxu1 %vm4494_vm0, %v4493_v0  ;;  %4357 = vmatprep.subr.mxu0 %v4493_v0 }
 0x197   : > { %4350 = vmatmul.mubr.f32.vlgmr.msra.gmra.mxu0 %v2259_v45  ;;  %v2708_v62 = vsub.f32 %v2639_v59, %v2707_v60  ;;  %4375 = vmatmul.mubr.f32.vlgmr.msra.gmra.mxu1 %v2707_v60 }
 0x198   : > { %4358 = vmatpush3.msra.mxu0 %v2301_v17  ;;  %4382 = vmatprep.subr.mxu1 %v4493_v0  ;;  %v3648_v17 = vand.u32 4294901760, %v4808_v11 }
 0x199   : > { %v2164_v2 = vpop.xlane.xlu1 %2163  ;;  %4359 = vmatprep.mubr.msk.f32.mxu0 %vm4494_vm0, %v4493_v0  ;;  %4383 = vmatpush3.msra.mxu1 %v4751_v38  ;;  %v2709_v3 = vand.u32 4294901760, %v2708_v62 }
 0x19a   : > { %v2168_v4 = vsub.f32 %v4745_v31, %v2164_v2  ;;  %4384 = vmatprep.mubr.msk.f32.mxu1 %vm4494_vm0, %v4493_v0  ;;  %4367 = vmatprep.subr.mxu0 %v4493_v0  ;;  %v3649_v20 = vsub.f32 %v4808_v11, %v3648_v17 }
 0x19b   : > { %4360 = vmatmul.mubr.f32.vlgmr.msra.gmra.mxu0 %v2258_v30  ;;  %4385 = vmatmul.mubr.f32.vlgmr.msra.gmra.mxu1 %v2709_v3  ;;  %v2710_v7 = vsub.f32 %v2708_v62, %v2709_v3 }
 0x19c   : > { %v2175_v8 = vmul.f32 1.442695, %v2168_v4  ;;  %4368 = vmatpush3.msra.mxu0 %v4751_v38  ;;  %4392 = vmatprep.subr.mxu1 %v4493_v0  ;;  %v3650_v23 = vand.u32 4294901760, %v3649_v20 }
 0x19d   : > { %4369 = vmatprep.mubr.msk.f32.mxu0 %vm4494_vm0, %v4493_v0  ;;  %4393 = vmatpush3.msra.mxu1 %v4751_v38  ;;  %v2711_v9 = vand.u32 4294901760, %v2710_v7 }
 0x19e   : > { %4475 = vpow2.f32 %v2175_v8  ;;  %4394 = vmatprep.mubr.msk.f32.mxu1 %vm4494_vm0, %v4493_v0  ;;  %4377 = vmatprep.subr.mxu0 %v4493_v0 }
 0x19f   : > { %v4474_v12 = vpop.eup %4473  ;;  %4370 = vmatmul.mubr.f32.vlgmr.msra.gmra.mxu0 %v2711_v9  ;;  %4395 = vmatmul.mubr.f32.vlgmr.msra.gmra.mxu1 %v2707_v60 }
 0x1a0   : > { %4378 = vmatpush3.msra.mxu0 %v4754_v27  ;;  %4402 = vmatprep.subr.mxu1 %v4493_v0  ;;  %v2183_v14 = vsel %vm2152_vm8, %v4474_v12, 0.0  ;;  %v3088_v15 = vsel %vm2152_vm8, %v4474_v12, 0 }
 0x1a1   : > { %2184 = vadd.xlane.f32.xlu1 %v2183_v14  ;;  %4379 = vmatprep.mubr.msk.f32.mxu0 %vm4494_vm0, %v4493_v0  ;;  %v3156_v16 = vand.u32 4294901760, %v3088_v15 }
 0x1a2   : > { %4403 = vmatpush3.msra.mxu1 %v3201_v10  ;;  %4404 = vmatprep.mubr.msk.f32.mxu1 %vm4494_vm0, %v4493_v0 }
 0x1a3   : > { %4380 = vmatmul.mubr.f32.vlgmr.msra.gmra.mxu0 %v2708_v62  ;;  %4387 = vmatprep.subr.mxu0 %v4493_v0  ;;  %v3157_v18 = vsub.f32 %v3088_v15, %v3156_v16 }
 0x1a4   : > { %4405 = vmatmul.mubr.f32.vlgmr.msra.gmra.mxu1 %v3156_v16  ;;  %4388 = vmatpush3.msra.mxu0 %v2750_v44 }
 0x1a5   : > { %4412 = vmatprep.subr.mxu1 %v4493_v0  ;;  %4389 = vmatprep.mubr.msk.f32.mxu0 %vm4494_vm0, %v4493_v0  ;;  %v3158_v19 = vand.u32 4294901760, %v3157_v18 }
 0x1a6   : > { %4413 = vmatpush3.msra.mxu1 %v4766_v51  ;;  %4414 = vmatprep.mubr.msk.f32.mxu1 %vm4494_vm0, %v4493_v0 }
 0x1a7   : > { %4390 = vmatmul.mubr.f32.vlgmr.msra.gmra.mxu0 %v2707_v60  ;;  %4397 = vmatprep.subr.mxu0 %v4493_v0  ;;  %v3159_v21 = vsub.f32 %v3157_v18, %v3158_v19 }
 0x1a8   : > { %4415 = vmatmul.mubr.f32.vlgmr.msra.gmra.mxu1 %v3158_v19  ;;  %4398 = vmatpush3.msra.mxu0 %v4766_v51 }
 0x1a9   : > { %4422 = vmatprep.subr.mxu1 %v4493_v0  ;;  %4399 = vmatprep.mubr.msk.f32.mxu0 %vm4494_vm0, %v4493_v0  ;;  %v3160_v22 = vand.u32 4294901760, %v3159_v21 }
 0x1aa   : > { %4423 = vmatpush3.msra.mxu1 %v4766_v51  ;;  %4424 = vmatprep.mubr.msk.f32.mxu1 %vm4494_vm0, %v4493_v0 }
 0x1ab   : > { %v4476_v1 = vpop.eup %4475  ;;  %4400 = vmatmul.mubr.f32.vlgmr.msra.gmra.mxu0 %v3160_v22  ;;  %4407 = vmatprep.subr.mxu0 %v4493_v0 }
 0x1ac   : > { %4425 = vmatmul.mubr.f32.vlgmr.msra.gmra.mxu1 %v3156_v16  ;;  %4408 = vmatpush3.msra.mxu0 %v4772_v56  ;;  %v2186_v24 = vsel %vm2152_vm8, %v4476_v1, 0.0  ;;  %v3537_v25 = vsel %vm2152_vm8, %v4476_v1, 0 }
 0x1ad   : > { %4432 = vmatprep.subr.mxu1 %v4493_v0  ;;  %2187 = vadd.xlane.f32.xlu1 %v2186_v24  ;;  %v3605_v26 = vand.u32 4294901760, %v3537_v25 }
 0x1ae   : > { %4409 = vmatprep.mubr.msk.f32.mxu0 %vm4494_vm0, %v4493_v0  ;;  %4433 = vmatpush3.msra.mxu1 %v3650_v23 }
 0x1af   : > { %4434 = vmatprep.mubr.msk.f32.mxu1 %vm4494_vm0, %v4493_v0  ;;  %4410 = vmatmul.mubr.f32.vlgmr.msra.gmra.mxu0 %v3157_v18  ;;  %v3606_v28 = vsub.f32 %v3537_v25, %v3605_v26 }
 0x1b0   : > { %4417 = vmatprep.subr.mxu0 %v4493_v0  ;;  %4435 = vmatmul.mubr.f32.vlgmr.msra.gmra.mxu1 %v3605_v26 }
 0x1b1   : > { %4418 = vmatpush3.msra.mxu0 %v3199_v61  ;;  %4442 = vmatprep.subr.mxu1 %v4493_v0  ;;  %v3607_v29 = vand.u32 4294901760, %v3606_v28 }
 0x1b2   : > { %4419 = vmatprep.mubr.msk.f32.mxu0 %vm4494_vm0, %v4493_v0  ;;  %4443 = vmatpush3.msra.mxu1 %v4797_v6 }
 0x1b3   : > { %4444 = vmatprep.mubr.msk.f32.mxu1 %vm4494_vm0, %v4493_v0  ;;  %4420 = vmatmul.mubr.f32.vlgmr.msra.gmra.mxu0 %v3156_v16  ;;  %v3608_v31 = vsub.f32 %v3606_v28, %v3607_v29 }
 0x1b4   : > { %4427 = vmatprep.subr.mxu0 %v4493_v0  ;;  %4445 = vmatmul.mubr.f32.vlgmr.msra.gmra.mxu1 %v3607_v29 }
 0x1b5   : > { %4428 = vmatpush3.msra.mxu0 %v4797_v6  ;;  %4452 = vmatprep.subr.mxu1 %v4493_v0  ;;  %v3609_v32 = vand.u32 4294901760, %v3608_v31 }
 0x1b6   : > { %4429 = vmatprep.mubr.msk.f32.mxu0 %vm4494_vm0, %v4493_v0  ;;  %4453 = vmatpush3.msra.mxu1 %v4797_v6 }
 0x1b7   : > { %4454 = vmatprep.mubr.msk.f32.mxu1 %vm4494_vm0, %v4493_v0  ;;  %4430 = vmatmul.mubr.f32.vlgmr.msra.gmra.mxu0 %v3609_v32 }
 0x1b8   : > { %4437 = vmatprep.subr.mxu0 %v4493_v0  ;;  %4455 = vmatmul.mubr.f32.vlgmr.msra.gmra.mxu1 %v3605_v26 }
 0x1b9   : > { %4438 = vmatpush3.msra.mxu0 %v4808_v11  ;;  %4439 = vmatprep.mubr.msk.f32.mxu0 %vm4494_vm0, %v4493_v0 }
 0x1ba   : > { %4447 = vmatprep.subr.mxu0 %v4493_v0 }
 0x1bb   : > { %4440 = vmatmul.mubr.f32.vlgmr.msra.gmra.mxu0 %v3606_v28 }
 0x1bc   : > { %4448 = vmatpush3.msra.mxu0 %v3648_v17  ;;  %4449 = vmatprep.mubr.msk.f32.mxu0 %vm4494_vm0, %v4493_v0 }
 0x1bf   : > { %4450 = vmatmul.mubr.f32.vlgmr.msra.gmra.mxu0 %v3605_v26 }
 0x212   : > { %v2179_v35 = vpop.xlane.xlu1 %2178 }
 0x213   : > { %4477 = vrcp.f32 %v2179_v35 }
 0x21e   : > { %v2182_v46 = vpop.xlane.xlu1 %2181 }
 0x21f   : > { %4479 = vrcp.f32 %v2182_v46 }
 0x220   : > { %v4478_v53 = vpop.eup %4477 }
 0x22a   : > { %v2185_v5 = vpop.xlane.xlu1 %2184 }
 0x22b   : > { %4481 = vrcp.f32 %v2185_v5 }
 0x22c   : > { %v4480_v12 = vpop.eup %4479 }
 0x236   : > { %v2188_v26 = vpop.xlane.xlu1 %2187 }
 0x237   : > { %4483 = vrcp.f32 %v2188_v26 }
 0x238   : > { %v4482_v35 = vpop.eup %4481 }
 0x24b   : > { %v2340_v33 = vpop.f32.mrf.mxu1 }
 0x24d   : > { %v4346_v34 = vpop.f32.mrf.mxu1 }
 0x24f   : > { %v2488_v36 = vpop.f32.mrf.mxu1 }
 0x251   : > { %v4356_v37 = vpop.f32.mrf.mxu1 }
 0x253   : > { %v2264_v38 = vpop.f32.mrf.mxu0  ;;  %v2634_v39 = vpop.f32.mrf.mxu1 }
 0x254   : > { %v2341_v41 = vadd.f32 %v2340_v33, %v2264_v38 }
 0x255   : > { %v4341_v40 = vpop.f32.mrf.mxu0  ;;  %v4366_v27 = vpop.f32.mrf.mxu1 }
 0x257   : > { %v2414_v42 = vpop.f32.mrf.mxu0  ;;  %v2789_v43 = vpop.f32.mrf.mxu1 }
 0x258   : > { %v2415_v30 = vadd.f32 %v2414_v42, %v2341_v41 }
 0x259   : > { %v4351_v44 = vpop.f32.mrf.mxu0  ;;  %v4376_v45 = vpop.f32.mrf.mxu1 }
 0x25a   : > { %v2489_v0 = vadd.f32 %v2488_v36, %v2415_v30 }
 0x25b   : > { %v2562_v47 = vpop.f32.mrf.mxu0  ;;  %v2937_v48 = vpop.f32.mrf.mxu1 }
 0x25c   : > { %v2563_v49 = vadd.f32 %v2562_v47, %v2489_v0 }
 0x25d   : > { %v4361_v50 = vpop.f32.mrf.mxu0  ;;  %v4386_v51 = vpop.f32.mrf.mxu1 }
 0x25e   : > { %v2635_v52 = vadd.f32 %v2634_v39, %v2563_v49 }
 0x25f   : > { %v2713_v54 = vpop.f32.mrf.mxu0  ;;  %v3083_v55 = vpop.f32.mrf.mxu1 }
 0x260   : > { %v3986_v56 = vmul.f32 %v4478_v53, %v2635_v52  ;;  %v2790_v60 = vadd.f32 %v2789_v43, %v2713_v54 }
 0x261   : > { %v4371_v57 = vpop.f32.mrf.mxu0  ;;  %v4396_v58 = vpop.f32.mrf.mxu1 }
 0x262   : > { %v3993_v59 = vsel %vm2136_vm5, %v3986_v56, 0.0 }
 0x263   : > { %3997 = vst.msk [vmem:[%s4874_s14] sm:$0xff] %vm310_vm1, %v3993_v59  ;;  %v2863_v61 = vpop.f32.mrf.mxu0 }
 0x264   : > { %v2864_v62 = vadd.f32 %v2863_v61, %v2790_v60  ;;  %v3238_v63 = vpop.f32.mrf.mxu1 }
 0x265   : > { %v4381_v2 = vpop.f32.mrf.mxu0 }
 0x266   : > { %v4406_v3 = vpop.f32.mrf.mxu1  ;;  %v2938_v4 = vadd.f32 %v2937_v48, %v2864_v62  ;;  %v4484_v48 = vpop.eup %4483 }
 0x267   : > { %v3011_v6 = vpop.f32.mrf.mxu0 }
 0x268   : > { %v3012_v7 = vadd.f32 %v3011_v6, %v2938_v4  ;;  %v3386_v8 = vpop.f32.mrf.mxu1 }
 0x269   : > { %v4391_v9 = vpop.f32.mrf.mxu0 }
 0x26a   : > { %v3084_v10 = vadd.f32 %v3083_v55, %v3012_v7  ;;  %v4416_v11 = vpop.f32.mrf.mxu1 }
 0x26b   : > { %v3162_v14 = vpop.f32.mrf.mxu0 }
 0x26c   : > { %v3988_v15 = vmul.f32 %v4480_v12, %v3084_v10  ;;  %v3532_v16 = vpop.f32.mrf.mxu1  ;;  %v3239_v19 = vadd.f32 %v3238_v63, %v3162_v14 }
 0x26d   : > { %v4401_v17 = vpop.f32.mrf.mxu0 }
 0x26e   : > { %v3994_v18 = vsel %vm2136_vm5, %v3988_v15, 0.0  ;;  %v4426_v20 = vpop.f32.mrf.mxu1 }
 0x26f   : > { %3998 = vst.msk [vmem:[%s4874_s14 + $0x8] sm:$0xff] %vm310_vm1, %v3994_v18  ;;  %v3312_v21 = vpop.f32.mrf.mxu0 }
 0x270   : > { %v3313_v22 = vadd.f32 %v3312_v21, %v3239_v19  ;;  %v3687_v23 = vpop.f32.mrf.mxu1 }
 0x271   : > { %v4411_v1 = vpop.f32.mrf.mxu0 }
 0x272   : > { %v4436_v24 = vpop.f32.mrf.mxu1  ;;  %v3387_v25 = vadd.f32 %v3386_v8, %v3313_v22 }
 0x273   : > { %v3460_v28 = vpop.f32.mrf.mxu0 }
 0x274   : > { %v3461_v29 = vadd.f32 %v3460_v28, %v3387_v25  ;;  %v3835_v31 = vpop.f32.mrf.mxu1 }
 0x275   : > { %v4421_v32 = vpop.f32.mrf.mxu0 }
 0x276   : > { %v3533_v33 = vadd.f32 %v3532_v16, %v3461_v29  ;;  %v4446_v34 = vpop.f32.mrf.mxu1 }
 0x277   : > { %v3611_v36 = vpop.f32.mrf.mxu0 }
 0x278   : > { %v3990_v37 = vmul.f32 %v4482_v35, %v3533_v33  ;;  %v3981_v38 = vpop.f32.mrf.mxu1  ;;  %v3688_v27 = vadd.f32 %v3687_v23, %v3611_v36 }
 0x279   : > { %v4431_v39 = vpop.f32.mrf.mxu0 }
 0x27a   : > { %v3995_v40 = vsel %vm2136_vm5, %v3990_v37, 0.0  ;;  %v4456_v41 = vpop.f32.mrf.mxu1 }
 0x27b   : > { %3999 = vst.msk [vmem:[%s4874_s14 + $0x10] sm:$0xff] %vm310_vm1, %v3995_v40  ;;  %v3761_v42 = vpop.f32.mrf.mxu0 }
 0x27c   : > { %v3762_v43 = vadd.f32 %v3761_v42, %v3688_v27 }
 0x27d   : > { %v4441_v30 = vpop.f32.mrf.mxu0 }
 0x27e   : > { %v3836_v44 = vadd.f32 %v3835_v31, %v3762_v43 }
 0x27f   : > { %v3909_v45 = vpop.f32.mrf.mxu0 }
 0x280   : > { %v3910_v46 = vadd.f32 %v3909_v45, %v3836_v44 }
 0x281   : > { %v4451_v0 = vpop.f32.mrf.mxu0 }
 0x282   : > { %v3982_v47 = vadd.f32 %v3981_v38, %v3910_v46 }
 0x284   : > { %v3992_v49 = vmul.f32 %v4484_v48, %v3982_v47 }
 0x286   : > { %v3996_v50 = vsel %vm2136_vm5, %v3992_v49, 0.0 }
 0x287   : > { %4000 = vst.msk [vmem:[%s4874_s14 + $0x18] sm:$0xff] %vm310_vm1, %v3996_v50 }
 0x288 PF: > { %s15_s18 = sadd.s32 1, %s4491_s18  }
 0x289   : > { %p12_p4 = scmp.ge.s32.totalorder %s15_s18, 4  }
 0x28b   :  { %14 = sbr.rel (!%p12_p4) target bundleno = 1 (0x1), region = 82 }

</bundles_post_ra>
